<compile_context>
chip_gen: v7x
topology: tpu7x:2x2x1
jax: 0.10.0
libtpu: 0.0.40
codegen_flags: <defaults>
</compile_context>

<pallas_src>
import jax
import jax.numpy as jnp
from jax import lax
from jax.experimental import pallas as pl
from jax.experimental.pallas import tpu as pltpu

# ---- config (mirrors `args`) ------------------------------------------------
FILTER_SIZES = (2, 3, 4)
FILTER_NUM = 8
EMBED_DIM = 32
SEQ_LEN = 16
VOCAB_SIZE = 100
LABELS_NUM = 5          # args.multilabel == True, len(args.labels) == 5
BATCH = 12              # small demo batch (not a multiple of the tile -> exercises padding)

# ---- padded / tiling constants ----------------------------------------------
KMAX = max(FILTER_SIZES)            # 4 window taps (smaller filters zero-padded)
VOCAB_PAD = 128                      # vocab padded to one full lane vreg
CONV_PAD = 128                       # 3*F = 24 conv channels padded to 128 lanes
LABELS_PAD = 128                     # 5 labels padded to 128 lanes (lane-dense store)
TILE_B = 8                           # sequences per grid step (8*S = 128 sublanes)


def textcnn_kernel(tok_ref, g_ref, bias_ref, mask_ref, fcw_ref, fcb_ref, out_ref):
    """One batch tile: fused gather+conv matmul -> bias/ReLU -> masked max-pool -> FC -> sigmoid."""
    bs, kmax = tok_ref.shape                 # (tile_b * S, KMAX)
    vp = g_ref.shape[0] // kmax              # padded vocab
    cp = bias_ref.shape[1]                   # padded conv channels
    seq = mask_ref.shape[0]                  # S
    tile_b = out_ref.shape[0]                # batch tile

    tok = tok_ref[...]                                               # (bs, KMAX) int32
    lane = lax.broadcasted_iota(jnp.int32, (bs, vp), 1)              # vocab index per lane

    # One-hot "im2col" patch: columns [k*vp : (k+1)*vp] are the one-hot of the k-th
    # window tap's token.  Each 128-lane block is vreg-aligned, so the concat is pure
    # vreg placement (no masked selects).
    patch = jnp.concatenate(
        [(lane == tok[:, k:k + 1]).astype(jnp.float32) for k in range(kmax)],
        axis=1)                                                      # (bs, KMAX*vp) = (128, 512)

    # Fused embedding-gather + all-filter-size conv: one lane-dense MXU matmul,
    # contraction dim = 512 (4 full 128-wide passes).
    conv = jnp.dot(patch, g_ref[...], preferred_element_type=jnp.float32)   # (bs, cp)
    conv = jnp.maximum(conv + bias_ref[...], 0.0)                    # bias + ReLU

    # Mask out invalid conv positions per filter-size column block (values are >= 0
    # after ReLU, so multiply-by-0 masking is exact for the max), then pool over time.
    conv = conv.reshape(tile_b, seq, cp) * mask_ref[...][None, :, :]
    pooled = jnp.max(conv, axis=1)                                   # (tile_b, cp)

    # TODO(synk): nn.Dropout is identity in eval mode; no RNG dropout applied here.
    logits = jnp.dot(pooled, fcw_ref[...],
                     preferred_element_type=jnp.float32) + fcb_ref[...]
    out_ref[...] = jax.nn.sigmoid(logits)                            # (tile_b, 128) lane-dense


def textcnn_forward(tokens, emb_table, conv_ws, conv_bs, fc_w, fc_b, *, tile_b=TILE_B):
    f32 = jnp.float32
    hi = lax.Precision.HIGHEST
    B, S = tokens.shape
    assert S == SEQ_LEN
    num_tiles = -(-B // tile_b)
    Bp = num_tiles * tile_b

    # ---- one-time weight prep (fold embedding into conv weights; pad to lane-dense shapes)
    emb_pad = jnp.zeros((VOCAB_PAD, EMBED_DIM), f32).at[:VOCAB_SIZE].set(emb_table.astype(f32))
    g_parts = []
    for k in range(KMAX):
        wk = jnp.zeros((EMBED_DIM, CONV_PAD), f32)
        for s_idx, (w_s, size) in enumerate(zip(conv_ws, FILTER_SIZES)):
            if k < size:                      # filters shorter than KMAX are zero-padded
                wk = wk.at[:, s_idx * FILTER_NUM:(s_idx + 1) * FILTER_NUM].set(
                    w_s[:, k, :].astype(f32).T)
        g_parts.append(jnp.dot(emb_pad, wk, precision=hi))           # (VOCAB_PAD, CONV_PAD)
    g = jnp.concatenate(g_parts, axis=0)                             # (KMAX*VOCAB_PAD, CONV_PAD)

    bias_pad = jnp.zeros((1, CONV_PAD), f32)
    for s_idx, b_s in enumerate(conv_bs):
        bias_pad = bias_pad.at[0, s_idx * FILTER_NUM:(s_idx + 1) * FILTER_NUM].set(
            b_s.reshape(-1).astype(f32))

    # valid-position mask: position p is valid for filter size s iff p <= S - s
    pos = jnp.arange(SEQ_LEN, dtype=jnp.int32)[:, None]
    thr = jnp.full((CONV_PAD,), -1, jnp.int32)
    for s_idx, size in enumerate(FILTER_SIZES):
        thr = thr.at[s_idx * FILTER_NUM:(s_idx + 1) * FILTER_NUM].set(SEQ_LEN - size)
    valid_mask = (pos <= thr[None, :]).astype(f32)                   # (S, CONV_PAD)

    # FC weights: pre-transposed (no in-kernel .T) and lane-padded
    fc_in = len(FILTER_SIZES) * FILTER_NUM
    fcw_pad = jnp.zeros((CONV_PAD, LABELS_PAD), f32).at[:fc_in, :LABELS_NUM].set(fc_w.astype(f32).T)
    fcb_pad = jnp.zeros((1, LABELS_PAD), f32).at[0, :LABELS_NUM].set(fc_b.reshape(-1).astype(f32))

    # ---- per-call token prep: pad batch to the tile, build the KMAX shifted window taps
    tok = jnp.pad(tokens.astype(jnp.int32), ((0, Bp - B), (0, KMAX - 1)))   # zero-pad time taps
    tok_shift = jnp.stack([tok[:, k:k + SEQ_LEN] for k in range(KMAX)], axis=-1)  # (Bp, S, KMAX)
    tok_shift = tok_shift.reshape(Bp * SEQ_LEN, KMAX)

    bs_tile = tile_b * SEQ_LEN
    out_pad = pl.pallas_call(
        textcnn_kernel,
        out_shape=jax.ShapeDtypeStruct((Bp, LABELS_PAD), f32),
        grid=(num_tiles,),
        in_specs=[
            pl.BlockSpec((bs_tile, KMAX), lambda i: (i, 0)),                 # shifted tokens
            pl.BlockSpec((KMAX * VOCAB_PAD, CONV_PAD), lambda i: (0, 0)),    # fused gather+conv W
            pl.BlockSpec((1, CONV_PAD), lambda i: (0, 0)),                   # conv bias
            pl.BlockSpec((SEQ_LEN, CONV_PAD), lambda i: (0, 0)),             # validity mask
            pl.BlockSpec((CONV_PAD, LABELS_PAD), lambda i: (0, 0)),          # fc weight (pre-T)
            pl.BlockSpec((1, LABELS_PAD), lambda i: (0, 0)),                 # fc bias
        ],
        out_specs=pl.BlockSpec((tile_b, LABELS_PAD), lambda i: (i, 0)),
        compiler_params=pltpu.CompilerParams(
            # batch tiles are independent -> split across TensorCores on v7x megacore
            dimension_semantics=("parallel",),
        ),
    )(tok_shift, g, bias_pad, valid_mask, fcw_pad, fcb_pad)

    return out_pad[:B, :LABELS_NUM]


def reference_forward(tokens, emb_table, conv_ws, conv_bs, fc_w, fc_b):
    """Pure-JAX reference mirroring the PyTorch forward."""
    hi = lax.Precision.HIGHEST
    x = jnp.take(emb_table, tokens, axis=0).astype(jnp.float32)      # (B, S, E)
    parts = []
    for (w, b, size) in zip(conv_ws, conv_bs, FILTER_SIZES):
        L = SEQ_LEN - size + 1
        acc = jnp.zeros((tokens.shape[0], L, FILTER_NUM), jnp.float32)
        for k in range(size):
            acc = acc + jnp.einsum('ble,fe->blf', x[:, k:k + L, :], w[:, k, :], precision=hi)
        acc = jnp.maximum(acc + b[None, :, :], 0.0)
        parts.append(jnp.max(acc, axis=1))
    feat = jnp.concatenate(parts, axis=1)
    logits = jnp.dot(feat, fc_w.T, precision=hi) + fc_b
    return jax.nn.sigmoid(logits)


if __name__ == "__main__":
    key = jax.random.PRNGKey(0)
    k_tok, k_emb, k_fcw, k_fcb, *k_convs = jax.random.split(key, 4 + 2 * len(FILTER_SIZES))

    tokens = jax.random.randint(k_tok, (BATCH, SEQ_LEN), 0, VOCAB_SIZE, dtype=jnp.int32)
    emb_table = jax.random.normal(k_emb, (VOCAB_SIZE, EMBED_DIM), jnp.float32) * 0.1

    conv_ws, conv_bs = [], []
    for i, size in enumerate(FILTER_SIZES):
        kw, kb = k_convs[2 * i], k_convs[2 * i + 1]
        conv_ws.append(jax.random.normal(kw, (FILTER_NUM, size, EMBED_DIM), jnp.float32) * 0.1)
        conv_bs.append(jax.random.normal(kb, (1, FILTER_NUM), jnp.float32) * 0.1)

    fc_in = len(FILTER_SIZES) * FILTER_NUM
    fc_w = jax.random.normal(k_fcw, (LABELS_NUM, fc_in), jnp.float32) * 0.1
    fc_b = jax.random.normal(k_fcb, (1, LABELS_NUM), jnp.float32) * 0.1

    out = textcnn_forward(tokens, emb_table, conv_ws, conv_bs, fc_w, fc_b)
    out = jax.block_until_ready(out)

    ref = reference_forward(tokens, emb_table, conv_ws, conv_bs, fc_w, fc_b)
    assert out.shape == (BATCH, LABELS_NUM)
    assert jnp.allclose(out, ref, atol=1e-4, rtol=1e-4), float(jnp.max(jnp.abs(out - ref)))

    print("KERNEL_OK")
</pallas_src>

<mosaic_0001>
module attributes {stable_mosaic.version = 11 : i64} {
  func.func @textcnn_kernel(%arg0: i32, %arg1: memref<128x4xi32, #tpu.memory_space<vmem>>, %arg2: memref<512x128xf32, #tpu.memory_space<vmem>>, %arg3: memref<1x128xf32, #tpu.memory_space<vmem>>, %arg4: memref<16x128xf32, #tpu.memory_space<vmem>>, %arg5: memref<128x128xf32, #tpu.memory_space<vmem>>, %arg6: memref<1x128xf32, #tpu.memory_space<vmem>>, %arg7: memref<8x128xf32, #tpu.memory_space<vmem>>) attributes {dimension_semantics = [#tpu.dimension_semantics<parallel>], iteration_bounds = array<i64: 2>, scalar_prefetch = 0 : i64, scratch_operands = 0 : i64, tpu.core_type = #tpu.core_type<tc>, window_params = [{transform_indices = @transform_0, window_bounds = array<i64: 128, 4>}, {pipeline_mode = #tpu.pipeline_mode<synchronous>, transform_indices = @transform_1, window_bounds = array<i64: 512, 128>}, {pipeline_mode = #tpu.pipeline_mode<synchronous>, transform_indices = @transform_2, window_bounds = array<i64: 1, 128>}, {pipeline_mode = #tpu.pipeline_mode<synchronous>, transform_indices = @transform_3, window_bounds = array<i64: 16, 128>}, {pipeline_mode = #tpu.pipeline_mode<synchronous>, transform_indices = @transform_4, window_bounds = array<i64: 128, 128>}, {pipeline_mode = #tpu.pipeline_mode<synchronous>, transform_indices = @transform_5, window_bounds = array<i64: 1, 128>}, {transform_indices = @transform_6, window_bounds = array<i64: 8, 128>}]} {
    %c0 = arith.constant 0 : index
    %c0_0 = arith.constant 0 : index
    %0 = vector.load %arg1[%c0, %c0_0] : memref<128x4xi32, #tpu.memory_space<vmem>>, vector<128x4xi32>
    %1 = tpu.iota {dimensions = array<i32: 1>} : vector<128x128xi32>
    %2 = vector.extract_strided_slice %0 {offsets = [0, 0], sizes = [128, 1], strides = [1, 1]} : vector<128x4xi32> to vector<128x1xi32>
    %3 = vector.broadcast %2 : vector<128x1xi32> to vector<128x128xi32>
    %4 = arith.cmpi eq, %1, %3 : vector<128x128xi32>
    %5 = arith.extui %4 : vector<128x128xi1> to vector<128x128xi32>
    %6 = arith.sitofp %5 : vector<128x128xi32> to vector<128x128xf32>
    %7 = vector.extract_strided_slice %0 {offsets = [0, 1], sizes = [128, 1], strides = [1, 1]} : vector<128x4xi32> to vector<128x1xi32>
    %8 = vector.broadcast %7 : vector<128x1xi32> to vector<128x128xi32>
    %9 = arith.cmpi eq, %1, %8 : vector<128x128xi32>
    %10 = arith.extui %9 : vector<128x128xi1> to vector<128x128xi32>
    %11 = arith.sitofp %10 : vector<128x128xi32> to vector<128x128xf32>
    %12 = vector.extract_strided_slice %0 {offsets = [0, 2], sizes = [128, 1], strides = [1, 1]} : vector<128x4xi32> to vector<128x1xi32>
    %13 = vector.broadcast %12 : vector<128x1xi32> to vector<128x128xi32>
    %14 = arith.cmpi eq, %1, %13 : vector<128x128xi32>
    %15 = arith.extui %14 : vector<128x128xi1> to vector<128x128xi32>
    %16 = arith.sitofp %15 : vector<128x128xi32> to vector<128x128xf32>
    %17 = vector.extract_strided_slice %0 {offsets = [0, 3], sizes = [128, 1], strides = [1, 1]} : vector<128x4xi32> to vector<128x1xi32>
    %18 = vector.broadcast %17 : vector<128x1xi32> to vector<128x128xi32>
    %19 = arith.cmpi eq, %1, %18 : vector<128x128xi32>
    %20 = arith.extui %19 : vector<128x128xi1> to vector<128x128xi32>
    %21 = arith.sitofp %20 : vector<128x128xi32> to vector<128x128xf32>
    %22 = tpu.concatenate %6, %11, %16, %21 in 1 : vector<128x128xf32>, vector<128x128xf32>, vector<128x128xf32>, vector<128x128xf32> -> vector<128x512xf32>
    %c0_1 = arith.constant 0 : index
    %c0_2 = arith.constant 0 : index
    %23 = vector.load %arg2[%c0_1, %c0_2] : memref<512x128xf32, #tpu.memory_space<vmem>>, vector<512x128xf32>
    %cst = arith.constant dense<0.000000e+00> : vector<128x128xf32>
    %24 = tpu.matmul %22, %23, %cst {dimension_numbers = #tpu.dot_dimension_numbers<[1], [0], [0], [1], [0, 0, 1, 1], [], []>} : vector<128x512xf32>, vector<512x128xf32>, vector<128x128xf32> -> vector<128x128xf32>
    %c0_3 = arith.constant 0 : index
    %c0_4 = arith.constant 0 : index
    %25 = vector.load %arg3[%c0_3, %c0_4] : memref<1x128xf32, #tpu.memory_space<vmem>>, vector<1x128xf32>
    %26 = vector.broadcast %25 : vector<1x128xf32> to vector<128x128xf32>
    %27 = arith.addf %24, %26 : vector<128x128xf32>
    %cst_5 = arith.constant 0.000000e+00 : f32
    %28 = vector.broadcast %cst_5 : f32 to vector<128x128xf32>
    %29 = arith.maximumf %27, %28 : vector<128x128xf32>
    %30 = vector.shape_cast %29 : vector<128x128xf32> to vector<8x16x128xf32>
    %c0_6 = arith.constant 0 : index
    %c0_7 = arith.constant 0 : index
    %31 = vector.load %arg4[%c0_6, %c0_7] : memref<16x128xf32, #tpu.memory_space<vmem>>, vector<16x128xf32>
    %32 = vector.shape_cast %31 : vector<16x128xf32> to vector<1x16x128xf32>
    %33 = vector.broadcast %32 : vector<1x16x128xf32> to vector<8x16x128xf32>
    %34 = arith.mulf %30, %33 : vector<8x16x128xf32>
    %cst_8 = arith.constant dense<0xFF800000> : vector<8x128xf32>
    %35 = vector.multi_reduction <maximumf>, %34, %cst_8 [1] : vector<8x16x128xf32> to vector<8x128xf32>
    %c0_9 = arith.constant 0 : index
    %c0_10 = arith.constant 0 : index
    %36 = vector.load %arg5[%c0_9, %c0_10] : memref<128x128xf32, #tpu.memory_space<vmem>>, vector<128x128xf32>
    %cst_11 = arith.constant dense<0.000000e+00> : vector<8x128xf32>
    %37 = tpu.matmul %35, %36, %cst_11 {dimension_numbers = #tpu.dot_dimension_numbers<[1], [0], [0], [1], [0, 0, 1, 1], [], []>} : vector<8x128xf32>, vector<128x128xf32>, vector<8x128xf32> -> vector<8x128xf32>
    %c0_12 = arith.constant 0 : index
    %c0_13 = arith.constant 0 : index
    %38 = vector.load %arg6[%c0_12, %c0_13] : memref<1x128xf32, #tpu.memory_space<vmem>>, vector<1x128xf32>
    %39 = vector.broadcast %38 : vector<1x128xf32> to vector<8x128xf32>
    %40 = arith.addf %37, %39 : vector<8x128xf32>
    %41 = arith.negf %40 : vector<8x128xf32>
    %42 = math.exp %41 : vector<8x128xf32>
    %cst_14 = arith.constant 1.000000e+00 : f32
    %43 = vector.broadcast %cst_14 : f32 to vector<8x128xf32>
    %44 = arith.addf %43, %42 : vector<8x128xf32>
    %45 = arith.divf %43, %44 : vector<8x128xf32>
    %c0_15 = arith.constant 0 : index
    %c0_16 = arith.constant 0 : index
    %46 = vector.load %arg7[%c0_15, %c0_16] : memref<8x128xf32, #tpu.memory_space<vmem>>, vector<8x128xf32>
    tpu.vector_store %arg7[%c0_15, %c0_16], %45 {strides = array<i32>} : memref<8x128xf32, #tpu.memory_space<vmem>>, vector<8x128xf32>,
    return
  }
  func.func @transform_0(%arg0: i32) -> (i32, i32) {
    %c0_i32 = arith.constant 0 : i32
    %c0_i32_0 = arith.constant 0 : i32
    return %arg0, %c0_i32 : i32, i32
  }
  func.func @transform_1(%arg0: i32) -> (i32, i32) {
    %c0_i32 = arith.constant 0 : i32
    %c0_i32_0 = arith.constant 0 : i32
    %c0_i32_1 = arith.constant 0 : i32
    return %c0_i32, %c0_i32_0 : i32, i32
  }
  func.func @transform_2(%arg0: i32) -> (i32, i32) {
    %c0_i32 = arith.constant 0 : i32
    %c0_i32_0 = arith.constant 0 : i32
    %c0_i32_1 = arith.constant 0 : i32
    return %c0_i32, %c0_i32_0 : i32, i32
  }
  func.func @transform_3(%arg0: i32) -> (i32, i32) {
    %c0_i32 = arith.constant 0 : i32
    %c0_i32_0 = arith.constant 0 : i32
    %c0_i32_1 = arith.constant 0 : i32
    return %c0_i32, %c0_i32_0 : i32, i32
  }
  func.func @transform_4(%arg0: i32) -> (i32, i32) {
    %c0_i32 = arith.constant 0 : i32
    %c0_i32_0 = arith.constant 0 : i32
    %c0_i32_1 = arith.constant 0 : i32
    return %c0_i32, %c0_i32_0 : i32, i32
  }
  func.func @transform_5(%arg0: i32) -> (i32, i32) {
    %c0_i32 = arith.constant 0 : i32
    %c0_i32_0 = arith.constant 0 : i32
    %c0_i32_1 = arith.constant 0 : i32
    return %c0_i32, %c0_i32_0 : i32, i32
  }
  func.func @transform_6(%arg0: i32) -> (i32, i32) {
    %c0_i32 = arith.constant 0 : i32
    %c0_i32_0 = arith.constant 0 : i32
    return %arg0, %c0_i32 : i32, i32
  }
}

</mosaic_0001>

<bundles_post_ra>
// kernel: tpu_custom_call.1
= control target key start
LH: loop header
LB: loop body
LE: loop exit
PB: predicated region body
PF: predicated region fallthrough
CT: control target
= control target key end

     0   :  { %11 = vsyncpa [#allocation3], 0  ;;  %s2559_s0 = inlined_call_operand.vmem [shape: s32[256,4], index: 0, kind: input, shape index: {}]   ;;  %s2560_s1 = inlined_call_operand.hbm [shape: f32[512,128], index: 1, kind: input, shape index: {}]   ;;  %s2561_s2 = inlined_call_operand.vmem [shape: f32[1,128], index: 2, kind: input, shape index: {}]   ;;  %s2562_s3 = inlined_call_operand.vmem [shape: f32[16,128], index: 3, kind: input, shape index: {}]   ;;  %s2563_s4 = inlined_call_operand.vmem [shape: f32[128,128], index: 4, kind: input, shape index: {}]   ;;  %s2564_s5 = inlined_call_operand.vmem [shape: f32[1,128], index: 5, kind: input, shape index: {}]   ;;  %s2565_s6 = inlined_call_operand.hbm [shape: f32[16,128], index: 6, kind: output, shape index: {}]  }
   0x1   :  { %12 = vsyncpa [#allocation4], 0 }
   0x2   :  { %14 = vsyncpa [#allocation4 + $0x1], 0  ;;  %s2030_s21 = smov 0   ;;  %s2032_s22 = smov 0  }
   0x3   :  { %s2034_s23 = smov 0   ;;  %s2036_s24 = smov 0  }
   0x4 LB: > { %s2051_s25 = sadd.s32 4294967295, %s1981_s24   ;;  %s1328_s26 = sadd.s32 4294967294, %s1981_s24   ;;  %s1981_s24 = sphi %s2036_s24, %s2581_s24   ;;  %s1977_s23 = sphi %s2034_s23, %s2580_s23   ;;  %s1973_s22 = sphi %s2032_s22, %s2579_s22   ;;  %s1969_s21 = sphi %s2030_s21, %s2578_s21  }
   0x5   : > { %s2055_s27 = sadd.s32 1, %s1981_s24   ;;  %s158_s28 = sadd.s32 1, %s1977_s23 }
   0x6   : > { %s155_s29 = ssub.s32 %s1981_s24, %s2055_s27  ;;  %p168_p0 = scmp.ne.s32.totalorder %s1977_s23, %s1973_s22 }
   0x7   : > { %p156_p1 = scmp.eq.s32.totalorder %s155_s29, 0  ;;  %p169_p2 = scmp.eq.s32.totalorder %s2051_s25, 1 }
   0x8   : > { %p174_p3 = scmp.ne.s32.totalorder %s1973_s22, %s1969_s21  ;;  %p175_p4 = scmp.eq.s32.totalorder %s1328_s26, 1 }
   0x9   : > { %s2066_s30 = scalar_select %p156_p1, %s1977_s23, %s158_s28  }
   0xa   : > { %p2068_p5 = por %p169_p2, %p168_p0  ;;  %p2072_p6 = por %p175_p4, %p174_p3 }
   0xb   : > { %p1329_p7 = scmp.ge.s32.totalorder %s1981_s24, 1  ;;  %p182_p8 = scmp.lt.s32.totalorder %s1981_s24, 3 }
   0xc   : > { %s2569_s7 = scalar_select %p2068_p5, 1, 0 }
   0xd   : > { %s2570_s8 = scalar_select %p2072_p6, 1, 0 }
   0xe   : > { %p2566_p9 = scmp.eq.s32.totalorder %s2051_s25, 0  ;;  %p2079_p10 = pnand %p1329_p7, %p182_p8 }
   0xf   : > { %s1983_s10 = smov [#allocation2]   ;;  %s1887_s15 = scalar_lea.hbm %s2560_s1, 8192 }
  0x10   : > { %s2571_s9 = scalar_select %p2079_p10, 1, 0 }
  0x11   : > { %s194_s11 = sshll.u32 %s1983_s10, 4  ;;  %p1778_p11 = pneg %p2079_p10  ;;  %s195_s11 = int_to_ptr.vmem [resolvable:$true] %s194_s11 }
  0x12   : > { %p1888_p13 = scmp.ne.s32.totalorder %s2560_s1, %s1887_s15  ;;  %p1894_p3 = scmp.lt.u32.totalorder %s1887_s15, %s2560_s1 }
  0x13   : > { %p2087_p12 = pnand %p2566_p9, %p1778_p11 }
  0x15   : > { %p1889_p0 = pneg %p2087_p12 }
  0x17   : > { %p1890_p1 = pnand %p1889_p0, %p1888_p13 }
  0x19   : > { %p1891_p2 = pneg %p1890_p1 }
  0x1b   : > { %p1896_p4 = pnand %p1894_p3, %p1891_p2 }
  0x1d   : > { %1899 = shalt.err (!%p1896_p4)
}
  0x1e   : > { %s1900_s20 = scalar_lea.vmem %s195_s11, 8192  ;;  %p1908_p9 = scmp.lt.s32.totalorder %s195_s11, %s195_s11 }
  0x1f   : > { %p1901_p7 = scmp.ne.s32.totalorder %s195_s11, %s1900_s20  ;;  %p1909_p6 = scmp.lt.s32.totalorder %s1900_s20, %s1900_s20 }
  0x21   : > { %p1903_p8 = pnand %p1901_p7, %p1889_p0  ;;  %p1910_p5 = por %p1909_p6, %p1908_p9 }
  0x23   : > { %p1904_p11 = pneg %p1903_p8 }
  0x25   : > { %p1911_p10 = pnand %p1910_p5, %p1904_p11 }
  0x27   : > { %1914 = shalt.err (!%p1911_p10)
}
  0x28   : > { %s1984_s26 = smov 128   ;;  %s1985_s28 = smov 8  }
  0x29   : > { %1781 = dma.hbm_to_vmem [thread:$0]  (!%p2087_p12), %s2560_s1, 8192, %s195_s11, [#allocation3], %s1984_s26, %s1984_s26, %s1985_s28  }
  0x2a   : > { %p2573_p13 = scmp.ne.s32.totalorder %s2571_s9, 0 }
  0x2b   : > { %p2574_p1 = scmp.eq.s32.totalorder (!%p2573_p13), %s2051_s25, 0 }
  0x2c   : > { %231 = sbr.rel (%p2573_p13) target bundleno = 883 (0x373), region = 44 }
  0x33   : > { %1960 = dma.done.wait (%p2574_p1), [#allocation3], 8192   ;;  %p2575_p0 = pmov %p2574_p1 }
  0x34   : > { %s1335_s13 = sshll.u32 %s2051_s25, 4  ;;  %v1986_v0 = vmov 3   ;;  %v1987_v1 = vmov 1   ;;  %v717_v4 = vld [vmem:[#allocation2 + $0x180] sm:$0xff]  ;;  %v718_v5 = vld [vmem:[#allocation2 + $0x188] sm:$0xff]  ;;  %v1988_v7 = vmov 2  }
  0x35   : > { %1962 = vsyncadd (%p2575_p0), [#allocation3], 4294959104  ;;  %1833 = vset.pattern.permute.xlu1 %v1986_v0  ;;  %1832 = vset.pattern.permute.xlu0 %v1987_v1  ;;  %p262_p5 = scmp.lt.s32.totalorder %s1335_s13, 31  ;;  %v701_v6 = vld [vmem:[#allocation2 + $0x100] sm:$0xff]  ;;  %v1716_v8 = vpack.c.bf16 %v718_v5, %v717_v4  ;;  %v702_v9 = vld [vmem:[#allocation2 + $0x108] sm:$0xff]  ;;  %s1469_s12 = sshll.u32 %s2051_s25, 7 }
  0x36   : > { %v719_v10 = vld [vmem:[#allocation2 + $0x190] sm:$0xff]  ;;  %v720_v11 = vld [vmem:[#allocation2 + $0x198] sm:$0xff]  ;;  %v1718_v12 = vpack.c.bf16 %v702_v9, %v701_v6  ;;  %v721_v16 = vld [vmem:[#allocation2 + $0x1a0] sm:$0xff]  ;;  %s2517_s17 = scalar_lea.hbm %s2565_s6, %s1469_s12  ;;  %p2576_p9 = scmp.ne.s32.totalorder %s2569_s7, 0 }
  0x37   : > { %s2583_s13 = smov (!%p262_p5, %s1335_s13), 31  ;;  %v1720_v13 = vpack.c.bf16 %v720_v11, %v719_v10  ;;  %v703_v14 = vld [vmem:[#allocation2 + $0x110] sm:$0xff]  ;;  %v704_v15 = vld [vmem:[#allocation2 + $0x118] sm:$0xff]  ;;  %1717 = vmatprep.subr.bf16.mxu1 %v1716_v8  ;;  %v722_v18 = vld [vmem:[#allocation2 + $0x1a8] sm:$0xff]  ;;  %v1989_v11 = vmov 0   ;;  %s1994_s25 = smov [#allocation5]  }
  0x38   : > { %s1336_s11 = sshll.u32 %s2583_s13, 3  ;;  %1719 = vmatpush3.bf16.msra.mxu1 %v1718_v12  ;;  %v1722_v19 = vpack.c.bf16 %v704_v15, %v703_v14  ;;  %v1724_v20 = vpack.c.bf16 %v722_v18, %v721_v16  ;;  %v705_v21 = vld [vmem:[#allocation2 + $0x120] sm:$0xff]  ;;  %v706_v22 = vld [vmem:[#allocation2 + $0x128] sm:$0xff]  ;;  %v723_v23 = vld [vmem:[#allocation2 + $0x1b0] sm:$0xff]  ;;  %s258_s13 = sand.u32 1, %s1973_s22  }
  0x39   : > { %s2119_s14 = scalar_lea.vmem %s2559_s0, %s1336_s11  ;;  %1721 = vmatprep.subr.bf16.mxu1 %v1720_v13  ;;  %v724_v24 = vld [vmem:[#allocation2 + $0x1b8] sm:$0xff]  ;;  %v1726_v25 = vpack.c.bf16 %v706_v22, %v705_v21  ;;  %v707_v27 = vld [vmem:[#allocation2 + $0x130] sm:$0xff]  ;;  %v725_v30 = vld [vmem:[#allocation2 + $0x1c0] sm:$0xff]  ;;  %s1334_s11 = sshll.u32 %s258_s13, 3 }
  0x3a   : > { %v2122_v2 = vld [vmem:[%s2119_s14] sm:$0xff]  ;;  %v2133_v17 = vld [vmem:[%s2119_s14 + $0x8] sm:$0xff]  ;;  %v1728_v26 = vpack.c.bf16 %v724_v24, %v723_v23  ;;  %v708_v28 = vld [vmem:[#allocation2 + $0x138] sm:$0xff]  ;;  %s260_s9 = scalar_lea.vmem [#allocation5], %s1334_s11  ;;  %s1244_s18 = scalar_lea.sflag [#allocation4], %s258_s13 }
  0x3b   : > { %574 = vperm.xlu1 %1833, %v2122_v2   ;;  %382 = vperm.xlu0 %1832, %v2122_v2   ;;  %v2127_v3 = vld [vmem:[%s2119_s14 + $0x20] sm:$0xff]  ;;  %v2141_v29 = vld [vmem:[%s2119_s14 + $0x38] sm:$0xff]  ;;  %v726_v31 = vld [vmem:[#allocation2 + $0x1c8] sm:$0xff]  ;;  %v1730_v37 = vpack.c.bf16 %v708_v28, %v707_v27  ;;  %s1919_s20 = sshll.u32 %s1994_s25, 4  ;;  %s1920_s20 = int_to_ptr.vmem [resolvable:$false] %s1919_s20 }
  0x3c   : > { %1723 = vmatpush3.bf16.msra.mxu1 %v1722_v19  ;;  %v709_v32 = vld [vmem:[#allocation2 + $0x140] sm:$0xff]  ;;  %v710_v33 = vld [vmem:[#allocation2 + $0x148] sm:$0xff]  ;;  %v2146_v36 = vld [vmem:[%s2119_s14 + $0x10] sm:$0xff]  ;;  %v1732_v43 = vpack.c.bf16 %v726_v31, %v725_v30  ;;  %s1921_s26 = scalar_lea.vmem %s1920_s20, 256 }
  0x3d   : > { %1725 = vmatprep.subr.bf16.mxu1 %v1724_v20  ;;  %v685_v34 = vld [vmem:[#allocation2 + $0x80] sm:$0xff]  ;;  %v686_v35 = vld [vmem:[#allocation2 + $0x88] sm:$0xff]  ;;  %v727_v38 = vld [vmem:[#allocation2 + $0x1d0] sm:$0xff]  ;;  %v1734_v53 = vpack.c.bf16 %v710_v33, %v709_v32 }
  0x3e   : > { %v1684_v39 = vpack.c.bf16 %v686_v35, %v685_v34  ;;  %v669_v40 = vld [vmem:[#allocation2] sm:$0xff]  ;;  %v670_v41 = vld [vmem:[#allocation2 + $0x8] sm:$0xff]  ;;  %v687_v42 = vld [vmem:[#allocation2 + $0x90] sm:$0xff] }
  0x3f   : > { %1834 = vset.pattern.permute.xlu1 %v1988_v7  ;;  %394 = vperm.xlu0 %1832, %v2127_v3   ;;  %v1686_v44 = vpack.c.bf16 %v670_v41, %v669_v40  ;;  %v688_v45 = vld [vmem:[#allocation2 + $0x98] sm:$0xff]  ;;  %v671_v46 = vld [vmem:[#allocation2 + $0x10] sm:$0xff]  ;;  %v689_v50 = vld [vmem:[#allocation2 + $0xa0] sm:$0xff] }
  0x40   : > { %478 = vperm.xlu1 %1834, %v2122_v2   ;;  %1727 = vmatpush3.bf16.msra.mxu1 %v1726_v25  ;;  %v672_v47 = vld [vmem:[#allocation2 + $0x18] sm:$0xff]  ;;  %v1688_v49 = vpack.c.bf16 %v688_v45, %v687_v42  ;;  %v690_v51 = vld [vmem:[#allocation2 + $0xa8] sm:$0xff]  ;;  %v711_v54 = vld [vmem:[#allocation2 + $0x150] sm:$0xff] }
  0x41   : > { %1729 = vmatprep.subr.bf16.mxu1 %v1728_v26  ;;  %v728_v48 = vld [vmem:[#allocation2 + $0x1d8] sm:$0xff]  ;;  %1685 = vmatprep.subr.bf16.mxu0 %v1684_v39  ;;  %v1690_v52 = vpack.c.bf16 %v672_v47, %v671_v46  ;;  %v1692_v55 = vpack.c.bf16 %v690_v51, %v689_v50  ;;  %v673_v56 = vld [vmem:[#allocation2 + $0x20] sm:$0xff]  ;;  %v674_v57 = vld [vmem:[#allocation2 + $0x28] sm:$0xff] }
  0x42   : > { %1687 = vmatpush3.bf16.msra.mxu0 %v1686_v44  ;;  %v1736_v58 = vpack.c.bf16 %v728_v48, %v727_v38  ;;  %v712_v59 = vld [vmem:[#allocation2 + $0x158] sm:$0xff]  ;;  %v691_v60 = vld [vmem:[#allocation2 + $0xb0] sm:$0xff]  ;;  %v729_v62 = vld [vmem:[#allocation2 + $0x1e0] sm:$0xff]  ;;  %v1694_v4 = vpack.c.bf16 %v674_v57, %v673_v56 }
  0x43   : > { %1843 = vset.pattern.permute.xlu0 %v1988_v7  ;;  %v692_v61 = vld [vmem:[#allocation2 + $0xb8] sm:$0xff]  ;;  %v730_v63 = vld [vmem:[#allocation2 + $0x1e8] sm:$0xff]  ;;  %1689 = vmatprep.subr.bf16.mxu0 %v1688_v49  ;;  %v1738_v6 = vpack.c.bf16 %v712_v59, %v711_v54  ;;  %v713_v8 = vld [vmem:[#allocation2 + $0x160] sm:$0xff]  ;;  %v1990_v59 = vmov 1.0  }
  0x44   : > { %1835 = vset.pattern.permute.xlu1 %v1987_v1  ;;  %481 = vperm.xlu0 %1843, %v2133_v17   ;;  %v2154_v5 = vld [vmem:[%s2119_s14 + $0x28] sm:$0xff]  ;;  %v1696_v10 = vpack.c.bf16 %v692_v61, %v691_v60  ;;  %v1740_v12 = vpack.c.bf16 %v730_v63, %v729_v62  ;;  %v731_v13 = vld [vmem:[#allocation2 + $0x1f0] sm:$0xff]  ;;  %v676_v15 = vld [vmem:[#allocation2 + $0x38] sm:$0xff] }
  0x45   : > { %385 = vperm.xlu1 %1835, %v2133_v17   ;;  %1731 = vmatpush3.bf16.msra.mxu1 %v1730_v37  ;;  %v714_v9 = vld [vmem:[#allocation2 + $0x168] sm:$0xff]  ;;  %v675_v14 = vld [vmem:[#allocation2 + $0x30] sm:$0xff]  ;;  %v732_v16 = vld [vmem:[#allocation2 + $0x1f8] sm:$0xff] }
  0x46   : > { %1733 = vmatprep.subr.bf16.mxu1 %v1732_v43  ;;  %1691 = vmatpush3.bf16.msra.mxu0 %v1690_v52  ;;  %v693_v18 = vld [vmem:[#allocation2 + $0xc0] sm:$0xff]  ;;  %v694_v19 = vld [vmem:[#allocation2 + $0xc8] sm:$0xff]  ;;  %v1742_v21 = vpack.c.bf16 %v714_v9, %v713_v8  ;;  %v1698_v22 = vpack.c.bf16 %v676_v15, %v675_v14  ;;  %v1744_v23 = vpack.c.bf16 %v732_v16, %v731_v13  ;;  %v715_v24 = vld [vmem:[#allocation2 + $0x170] sm:$0xff] }
  0x47   : > { %1693 = vmatprep.subr.bf16.mxu0 %v1692_v55  ;;  %v2160_v20 = vld [vmem:[%s2119_s14 + $0x40] sm:$0xff]  ;;  %v716_v25 = vld [vmem:[#allocation2 + $0x178] sm:$0xff]  ;;  %v1700_v26 = vpack.c.bf16 %v694_v19, %v693_v18  ;;  %v678_v28 = vld [vmem:[#allocation2 + $0x48] sm:$0xff] }
  0x48   : > { %490 = vperm.xlu0 %1843, %v2127_v3   ;;  %v677_v27 = vld [vmem:[#allocation2 + $0x40] sm:$0xff]  ;;  %v695_v30 = vld [vmem:[#allocation2 + $0xd0] sm:$0xff]  ;;  %v696_v31 = vld [vmem:[#allocation2 + $0xd8] sm:$0xff]  ;;  %v1746_v33 = vpack.c.bf16 %v716_v25, %v715_v24 }
  0x49   : > { %1836 = vset.pattern.permute.xlu1 %v1986_v0  ;;  %1735 = vmatpush3.bf16.msra.mxu1 %v1734_v53  ;;  %v2166_v32 = vld [vmem:[%s2119_s14 + $0x58] sm:$0xff]  ;;  %v1702_v35 = vpack.c.bf16 %v678_v28, %v677_v27  ;;  %v1704_v37 = vpack.c.bf16 %v696_v31, %v695_v30  ;;  %v679_v38 = vld [vmem:[#allocation2 + $0x50] sm:$0xff]  ;;  %v698_v40 = vld [vmem:[#allocation2 + $0xe8] sm:$0xff] }
  0x4a   : > { %577 = vperm.xlu1 %1836, %v2133_v17   ;;  %1737 = vmatprep.subr.bf16.mxu1 %v1736_v58  ;;  %v270_v34 = vld [vmem:[%s2119_s14 + $0x18] sm:$0xff]  ;;  %v681_v43 = vld [vmem:[#allocation2 + $0x60] sm:$0xff]  ;;  %v682_v44 = vld [vmem:[#allocation2 + $0x68] sm:$0xff] }
  0x4b   : > { %1695 = vmatpush3.bf16.msra.mxu0 %v1694_v4  ;;  %v680_v39 = vld [vmem:[#allocation2 + $0x58] sm:$0xff]  ;;  %v699_v45 = vld [vmem:[#allocation2 + $0xf0] sm:$0xff]  ;;  %v1710_v47 = vpack.c.bf16 %v682_v44, %v681_v43 }
  0x4c   : > { %499 = vperm.xlu0 %1843, %v2141_v29   ;;  %1697 = vmatprep.subr.bf16.mxu0 %v1696_v10  ;;  %v1706_v41 = vpack.c.bf16 %v680_v39, %v679_v38  ;;  %v700_v46 = vld [vmem:[#allocation2 + $0xf8] sm:$0xff]  ;;  %v683_v49 = vld [vmem:[#allocation2 + $0x70] sm:$0xff] }
  0x4d   : > { %1739 = vmatpush3.bf16.msra.mxu1 %v1738_v6  ;;  %v1712_v48 = vpack.c.bf16 %v700_v46, %v699_v45  ;;  %v684_v50 = vld [vmem:[#allocation2 + $0x78] sm:$0xff]  ;;  %v273_v52 = vld [vmem:[%s2119_s14 + $0x30] sm:$0xff] }
  0x4e   : > { %1837 = vset.pattern.permute.xlu1 %v1987_v1  ;;  %1741 = vmatprep.subr.bf16.mxu1 %v1740_v12  ;;  %v1714_v51 = vpack.c.bf16 %v684_v50, %v683_v49  ;;  %v277_v53 = vld [vmem:[%s2119_s14 + $0x50] sm:$0xff]  ;;  %v2212_v55 = vld [vmem:[%s2119_s14 + $0x78] sm:$0xff] }
  0x4f   : > { %388 = vperm.xlu1 %1837, %v2146_v36   ;;  %1699 = vmatpush3.bf16.msra.mxu0 %v1698_v22  ;;  %v2205_v54 = vld [vmem:[%s2119_s14 + $0x70] sm:$0xff] }
  0x50   : > { %1854 = vset.pattern.permute.xlu0 %v1986_v0  ;;  %1701 = vmatprep.subr.bf16.mxu0 %v1700_v26 }
  0x51   : > { %580 = vperm.xlu0 %1854, %v2146_v36   ;;  %1743 = vmatpush3.bf16.msra.mxu1 %v1742_v21 }
  0x52   : > { %1745 = vmatprep.subr.bf16.mxu1 %v1744_v23 }
  0x53   : > { %1838 = vset.pattern.permute.xlu1 %v1989_v11  ;;  %1703 = vmatpush3.bf16.msra.mxu0 %v1702_v35 }
  0x54   : > { %292 = vperm.xlu1 %1838, %v2146_v36   ;;  %1705 = vmatprep.subr.bf16.mxu0 %v1704_v37 }
  0x55   : > { %589 = vperm.xlu0 %1854, %v2154_v5   ;;  %1747 = vmatpush3.bf16.msra.mxu1 %v1746_v33 }
  0x57   : > { %1707 = vmatpush3.bf16.msra.mxu0 %v1706_v41 }
  0x58   : > { %1839 = vset.pattern.permute.xlu1 %v1988_v7 }
  0x59   : > { %484 = vperm.xlu1 %1839, %v2146_v36   ;;  %598 = vperm.xlu0 %1854, %v2160_v20   ;;  %v697_v36 = vld [vmem:[#allocation2 + $0xe0] sm:$0xff] }
  0x5a   : > { %v1708_v42 = vpack.c.bf16 %v698_v40, %v697_v36 }
  0x5c   : > { %1709 = vmatprep.subr.bf16.mxu0 %v1708_v42 }
  0x5d   : > { %1840 = vset.pattern.permute.xlu1 %v1987_v1  ;;  %607 = vperm.xlu0 %1854, %v2166_v32  }
  0x5e   : > { %391 = vperm.xlu1 %1840, %v270_v34   ;;  %1711 = vmatpush3.bf16.msra.mxu0 %v1710_v47 }
  0x5f   : > { %1713 = vmatprep.subr.bf16.mxu0 %v1712_v48 }
  0x61   : > { %1865 = vset.pattern.permute.xlu0 %v1989_v11 }
  0x62   : > { %1841 = vset.pattern.permute.xlu1 %v1986_v0  ;;  %286 = vperm.xlu0 %1865, %v2122_v2   ;;  %v276_v2 = vld [vmem:[%s2119_s14 + $0x48] sm:$0xff] }
  0x63   : > { %583 = vperm.xlu1 %1841, %v270_v34   ;;  %1715 = vmatpush3.bf16.msra.mxu0 %v1714_v51 }
  0x66   : > { %289 = vperm.xlu0 %1865, %v2133_v17   ;;  %v2183_v17 = vld [vmem:[%s2119_s14 + $0x60] sm:$0xff] }
  0x67   : > { %1842 = vset.pattern.permute.xlu1 %v1988_v7 }
  0x68   : > { %487 = vperm.xlu1 %1842, %v270_v34  }
  0x6a   : > { %295 = vperm.xlu0 %1865, %v270_v34  }
  0x6c   : > { %1844 = vset.pattern.permute.xlu1 %v1989_v11 }
  0x6d   : > { %298 = vperm.xlu1 %1844, %v2127_v3  }
  0x6e   : > { %304 = vperm.xlu0 %1865, %v273_v52  }
  0x71   : > { %1845 = vset.pattern.permute.xlu1 %v1986_v0 }
  0x72   : > { %586 = vperm.xlu1 %1845, %v2127_v3   ;;  %313 = vperm.xlu0 %1865, %v276_v2   ;;  %v2195_v3 = vld [vmem:[%s2119_s14 + $0x68] sm:$0xff]  ;;  %s1257_s14 = sshll.u32 %s260_s9, 4  ;;  %s2519_s14 = int_to_ptr.vmem [resolvable:$true] %s1257_s14 }
  0x73   : > { %s1915_s19 = scalar_lea.vmem %s2519_s14, 128  ;;  %p1922_p2 = scmp.lt.s32.totalorder %s2519_s14, %s1920_s20 }
  0x74   : > { %p1916_p6 = scmp.ne.s32.totalorder %s2519_s14, %s1915_s19  ;;  %p1923_p3 = scmp.lt.s32.totalorder %s1921_s26, %s1915_s19 }
  0x76   : > { %1846 = vset.pattern.permute.xlu1 %v1987_v1  ;;  %322 = vperm.xlu0 %1865, %v2183_v17   ;;  %p1917_p10 = pnand %p1916_p6, %p2576_p9  ;;  %p1924_p4 = por %p1923_p3, %p1922_p2 }
  0x77   : > { %397 = vperm.xlu1 %1846, %v2154_v5  }
  0x78   : > { %p1918_p12 = pneg %p1917_p10 }
  0x7a   : > { %1868 = vset.pattern.permute.xlu0 %v1987_v1  ;;  %p1925_p7 = pnand %p1924_p4, %p1918_p12 }
  0x7b   : > { %1847 = vset.pattern.permute.xlu1 %v1989_v11  ;;  %403 = vperm.xlu0 %1868, %v2141_v29  }
  0x7c   : > { %301 = vperm.xlu1 %1847, %v2154_v5  }
  0x7f   : > { %412 = vperm.xlu0 %1868, %v277_v53  }
  0x80   : > { %1848 = vset.pattern.permute.xlu1 %v1988_v7 }
  0x81   : > { %493 = vperm.xlu1 %1848, %v2154_v5  }
  0x83   : > { %421 = vperm.xlu0 %1868, %v2195_v3  }
  0x85   : > { %1849 = vset.pattern.permute.xlu1 %v1987_v1 }
  0x86   : > { %400 = vperm.xlu1 %1849, %v273_v52  }
  0x87   : > { %1871 = vset.pattern.permute.xlu0 %v1988_v7 }
  0x88   : > { %508 = vperm.xlu0 %1871, %v277_v53  }
  0x8a   : > { %1850 = vset.pattern.permute.xlu1 %v1986_v0 }
  0x8b   : > { %592 = vperm.xlu1 %1850, %v273_v52  }
  0x8c   : > { %517 = vperm.xlu0 %1871, %v2195_v3  }
  0x8f   : > { %1851 = vset.pattern.permute.xlu1 %v1988_v7 }
  0x90   : > { %496 = vperm.xlu1 %1851, %v273_v52   ;;  %1876 = vset.pattern.permute.xlu0 %v1986_v0 }
  0x91   : > { %616 = vperm.xlu0 %1876, %v2205_v54  }
  0x94   : > { %1852 = vset.pattern.permute.xlu1 %v1989_v11 }
  0x95   : > { %307 = vperm.xlu1 %1852, %v2141_v29   ;;  %1879 = vset.pattern.permute.xlu0 %v1989_v11 }
  0x96   : > { %331 = vperm.xlu0 %1879, %v2212_v55  }
  0x99   : > { %1853 = vset.pattern.permute.xlu1 %v1986_v0 }
  0x9a   : > { %595 = vperm.xlu1 %1853, %v2141_v29   ;;  %1882 = vset.pattern.permute.xlu0 %v1986_v0  ;;  %v283_v29 = vlaneseq }
  0x9c   : > { %v2228_v56 = vand.u32 127, %v283_v29 }
  0x9e   : > { %1855 = vset.pattern.permute.xlu1 %v1987_v1 }
  0x9f   : > { %406 = vperm.xlu1 %1855, %v2160_v20  }
  0xa3   : > { %1856 = vset.pattern.permute.xlu1 %v1989_v11 }
  0xa4   : > { %310 = vperm.xlu1 %1856, %v2160_v20  }
  0xa8   : > { %1857 = vset.pattern.permute.xlu1 %v1988_v7 }
  0xa9   : > { %502 = vperm.xlu1 %1857, %v2160_v20  }
  0xad   : > { %1858 = vset.pattern.permute.xlu1 %v1987_v1 }
  0xae   : > { %409 = vperm.xlu1 %1858, %v276_v2  }
  0xb2   : > { %1859 = vset.pattern.permute.xlu1 %v1986_v0 }
  0xb3   : > { %601 = vperm.xlu1 %1859, %v276_v2  }
  0xb7   : > { %1860 = vset.pattern.permute.xlu1 %v1988_v7 }
  0xb8   : > { %505 = vperm.xlu1 %1860, %v276_v2  }
  0xba   : > { %v575_v57 = vpop.permute.xlu1 %574  ;;  %v383_v58 = vpop.permute.xlu0 %382 }
  0xbb   : > { %vm621_vm0 = vcmp.eq.s32.totalorder %v2228_v56, %v575_v57  ;;  %vm429_vm1 = vcmp.eq.s32.totalorder %v2228_v56, %v383_v58 }
  0xbc   : > { %1861 = vset.pattern.permute.xlu1 %v1989_v11  ;;  %1434 = vmatprep.mubr.msk.f32.mxu1 %vm621_vm0, %v1990_v59 }
  0xbd   : > { %316 = vperm.xlu1 %1861, %v277_v53   ;;  %1402 = vmatprep.mubr.msk.f32.mxu0 %vm429_vm1, %v1990_v59 }
  0xbe   : > { %v2235_v60 = vpop.permute.xlu0 %394 }
  0xbf   : > { %v479_v61 = vpop.permute.xlu1 %478  ;;  %vm433_vm0 = vcmp.eq.s32.totalorder %v2228_v56, %v2235_v60 }
  0xc0   : > { %vm525_vm2 = vcmp.eq.s32.totalorder %v2228_v56, %v479_v61 }
  0xc1   : > { %1862 = vset.pattern.permute.xlu1 %v1986_v0  ;;  %1435 = vmatmul.mubr.msk.f32.vlgmr.msra.gmra.mrb[0].mxu1 %vm525_vm2, %v1990_v59 }
  0xc2   : > { %604 = vperm.xlu1 %1862, %v277_v53  }
  0xc3   : > { %v482_v62 = vpop.permute.xlu0 %481 }
  0xc4   : > { %v386_v63 = vpop.permute.xlu1 %385  ;;  %vm526_vm3 = vcmp.eq.s32.totalorder %v2228_v56, %v482_v62 }
  0xc5   : > { %vm430_vm8 = vcmp.eq.s32.totalorder %v2228_v56, %v386_v63 }
  0xc6   : > { %1863 = vset.pattern.permute.xlu1 %v1987_v1 }
  0xc7   : > { %415 = vperm.xlu1 %1863, %v2166_v32   ;;  %v2242_v4 = vpop.permute.xlu0 %490 }
  0xc8   : > { %vm529_vm1 = vcmp.eq.s32.totalorder %v2228_v56, %v2242_v4 }
  0xc9   : > { %v578_v5 = vpop.permute.xlu1 %577 }
  0xca   : > { %vm622_vm4 = vcmp.eq.s32.totalorder %v2228_v56, %v578_v5 }
  0xcb   : > { %1864 = vset.pattern.permute.xlu1 %v1989_v11  ;;  %1436 = vmatprep.mubr.msk.f32.mxu1 %vm622_vm4, %v1990_v59  ;;  %v2248_v6 = vpop.permute.xlu0 %499 }
  0xcc   : > { %319 = vperm.xlu1 %1864, %v2166_v32   ;;  %1437 = vmatmul.mubr.msk.f32.gmra.mrb[2].mxu1 %vm526_vm3, %v1990_v59 }
  0xce   : > { %v389_v8 = vpop.permute.xlu1 %388 }
  0xcf   : > { %vm431_vm11 = vcmp.eq.s32.totalorder %v2228_v56, %v389_v8 }
  0xd0   : > { %1866 = vset.pattern.permute.xlu1 %v1988_v7  ;;  %v581_v9 = vpop.permute.xlu0 %580 }
  0xd1   : > { %511 = vperm.xlu1 %1866, %v2166_v32   ;;  %vm623_vm5 = vcmp.eq.s32.totalorder %v2228_v56, %v581_v9 }
  0xd2   : > { %1438 = vmatprep.mubr.msk.f32.mxu1 %vm623_vm5, %v1990_v59 }
  0xd3   : > { %v293_v10 = vpop.permute.xlu1 %292 }
  0xd4   : > { %v590_v12 = vpop.permute.xlu0 %589  ;;  %vm335_vm13 = vcmp.eq.s32.totalorder %v2228_v56, %v293_v10 }
  0xd5   : > { %1867 = vset.pattern.permute.xlu1 %v1987_v1  ;;  %vm626_vm4 = vcmp.eq.s32.totalorder %v2228_v56, %v590_v12  ;;  %v2409_v12 = vld [vmem:[%s2561_s2] ss:$0 sm:$0xff] }
  0xd6   : > { %418 = vperm.xlu1 %1867, %v2183_v17  }
  0xd8   : > { %v485_v13 = vpop.permute.xlu1 %484  ;;  %v2258_v14 = vpop.permute.xlu0 %598 }
  0xd9   : > { %vm527_vm6 = vcmp.eq.s32.totalorder %v2228_v56, %v485_v13 }
  0xda   : > { %1869 = vset.pattern.permute.xlu1 %v1986_v0  ;;  %1439 = vmatmul.mubr.msk.f32.gmra.mrb[4].mxu1 %vm527_vm6, %v1990_v59 }
  0xdb   : > { %610 = vperm.xlu1 %1869, %v2183_v17  }
  0xdc   : > { %v2264_v15 = vpop.permute.xlu0 %607 }
  0xdd   : > { %v392_v16 = vpop.permute.xlu1 %391 }
  0xde   : > { %vm432_vm14 = vcmp.eq.s32.totalorder %v2228_v56, %v392_v16 }
  0xdf   : > { %1870 = vset.pattern.permute.xlu1 %v1988_v7 }
  0xe0   : > { %514 = vperm.xlu1 %1870, %v2183_v17  }
  0xe1   : > { %v287_v18 = vpop.permute.xlu0 %286 }
  0xe2   : > { %vm333_vm7 = vcmp.eq.s32.totalorder %v2228_v56, %v287_v18  ;;  %v584_v19 = vpop.permute.xlu1 %583 }
  0xe3   : > { %vm624_vm9 = vcmp.eq.s32.totalorder %v2228_v56, %v584_v19  ;;  %1403 = vmatmul.mubr.msk.f32.vlgmr.msra.gmra.mrb[0].mxu0 %vm333_vm7, %v1990_v59 }
  0xe4   : > { %1872 = vset.pattern.permute.xlu1 %v1989_v11  ;;  %1404 = vmatprep.mubr.msk.f32.mxu0 %vm430_vm8, %v1990_v59 }
  0xe5   : > { %1440 = vmatprep.mubr.msk.f32.mxu1 %vm624_vm9, %v1990_v59  ;;  %325 = vperm.xlu1 %1872, %v2195_v3   ;;  %v290_v20 = vpop.permute.xlu0 %289 }
  0xe6   : > { %vm334_vm10 = vcmp.eq.s32.totalorder %v2228_v56, %v290_v20  ;;  %v1991_v20 = vmov 0.0|0.0  }
  0xe7   : > { %v488_v21 = vpop.permute.xlu1 %487  ;;  %1405 = vmatmul.mubr.msk.f32.gmra.mrb[2].mxu0 %vm334_vm10, %v1990_v59  ;;  %1748 = vmatprep.subr.bf16.mxu0 %v1991_v20 }
  0xe8   : > { %vm528_vm12 = vcmp.eq.s32.totalorder %v2228_v56, %v488_v21  ;;  %1406 = vmatprep.mubr.msk.f32.mxu0 %vm431_vm11, %v1990_v59  ;;  %v1120_v21 = vld [vmem:[%s2563_s4] sm:$0xff] }
  0xe9   : > { %1873 = vset.pattern.permute.xlu1 %v1986_v0  ;;  %1441 = vmatmul.mubr.msk.f32.gmra.mrb[6].mxu1 %vm528_vm12, %v1990_v59  ;;  %v296_v22 = vpop.permute.xlu0 %295 }
  0xea   : > { %613 = vperm.xlu1 %1873, %v2195_v3   ;;  %vm336_vm15 = vcmp.eq.s32.totalorder %v2228_v56, %v296_v22  ;;  %v1121_v22 = vld [vmem:[%s2563_s4 + $0x8] sm:$0xff] }
  0xeb   : > { %1407 = vmatmul.mubr.msk.f32.gmra.mrb[4].mxu0 %vm335_vm13, %v1990_v59 }
  0xec   : > { %v299_v23 = vpop.permute.xlu1 %298  ;;  %1408 = vmatprep.mubr.msk.f32.mxu0 %vm432_vm14, %v1990_v59  ;;  %vm532_vm14 = vcmp.eq.s32.totalorder %v2228_v56, %v2248_v6 }
  0xed   : > { %v305_v25 = vpop.permute.xlu0 %304  ;;  %vm337_vm2 = vcmp.eq.s32.totalorder %v2228_v56, %v299_v23 }
  0xee   : > { %1874 = vset.pattern.permute.xlu1 %v1987_v1  ;;  %vm339_vm8 = vcmp.eq.s32.totalorder %v2228_v56, %v305_v25  ;;  %v1122_v25 = vld [vmem:[%s2563_s4 + $0x10] sm:$0xff] }
  0xef   : > { %424 = vperm.xlu1 %1874, %v2205_v54   ;;  %1409 = vmatmul.mubr.msk.f32.gmra.mrb[6].mxu0 %vm336_vm15, %v1990_v59  ;;  %vm629_vm15 = vcmp.eq.s32.totalorder %v2228_v56, %v2258_v14 }
  0xf0   : > { %1410 = vmatprep.mubr.msk.f32.mxu0 %vm433_vm0, %v1990_v59 }
  0xf1   : > { %v587_v24 = vpop.permute.xlu1 %586  ;;  %v314_v27 = vpop.permute.xlu0 %313 }
  0xf2   : > { %vm625_vm3 = vcmp.eq.s32.totalorder %v2228_v56, %v587_v24  ;;  %v1749_v24 = vpack.c.bf16 %v1121_v22, %v1120_v21  ;;  %v1128_v21 = vld [vmem:[%s2563_s4 + $0x40] sm:$0xff]  ;;  %v1129_v22 = vld [vmem:[%s2563_s4 + $0x48] sm:$0xff] }
  0xf3   : > { %1875 = vset.pattern.permute.xlu1 %v1989_v11  ;;  %1411 = vmatmul.mubr.msk.f32.gmra.mrb[8].mxu0 %vm337_vm2, %v1990_v59 }
  0xf4   : > { %1442 = vmatprep.mubr.msk.f32.mxu1 %vm625_vm3, %v1990_v59  ;;  %328 = vperm.xlu1 %1875, %v2205_v54  }
  0xf5   : > { %1443 = vmatmul.mubr.msk.f32.gmra.mrb[8].mxu1 %vm529_vm1, %v1990_v59  ;;  %v2313_v28 = vpop.permute.xlu0 %322  ;;  %1750 = vmatpush3.bf16.msra.mxu0 %v1749_v24 }
  0xf6   : > { %v398_v26 = vpop.permute.xlu1 %397  ;;  %1444 = vmatprep.mubr.msk.f32.mxu1 %vm626_vm4, %v1990_v59  ;;  %vm342_vm4 = vcmp.eq.s32.totalorder %v2228_v56, %v314_v27  ;;  %1751 = vmatprep.subr.bf16.mxu0 %v1991_v20 }
  0xf7   : > { %vm434_vm5 = vcmp.eq.s32.totalorder %v2228_v56, %v398_v26  ;;  %v1123_v26 = vld [vmem:[%s2563_s4 + $0x18] sm:$0xff] }
  0xf8   : > { %1877 = vset.pattern.permute.xlu1 %v1988_v7  ;;  %1412 = vmatprep.mubr.msk.f32.mxu0 %vm434_vm5, %v1990_v59 }
  0xf9   : > { %520 = vperm.xlu1 %1877, %v2205_v54  }
  0xfa   : > { %v404_v31 = vpop.permute.xlu0 %403 }
  0xfb   : > { %v302_v11 = vpop.permute.xlu1 %301  ;;  %vm436_vm10 = vcmp.eq.s32.totalorder %v2228_v56, %v404_v31  ;;  %v1752_v31 = vpack.c.bf16 %v1123_v26, %v1122_v25 }
  0xfc   : > { %vm338_vm6 = vcmp.eq.s32.totalorder %v2228_v56, %v302_v11 }
  0xfd   : > { %1878 = vset.pattern.permute.xlu1 %v1987_v1  ;;  %1413 = vmatmul.mubr.msk.f32.gmra.mrb[10].mxu0 %vm338_vm6, %v1990_v59 }
  0xfe   : > { %427 = vperm.xlu1 %1878, %v2212_v55   ;;  %v413_v38 = vpop.permute.xlu0 %412  ;;  %1753 = vmatpush3.bf16.msra.mxu0 %v1752_v31 }
  0xff   : > { %vm439_vm6 = vcmp.eq.s32.totalorder %v2228_v56, %v413_v38  ;;  %1754 = vmatprep.subr.bf16.mxu0 %v1991_v20 }
 0x100   : > { %v494_v30 = vpop.permute.xlu1 %493 }
 0x101   : > { %vm530_vm7 = vcmp.eq.s32.totalorder %v2228_v56, %v494_v30 }
 0x102   : > { %1880 = vset.pattern.permute.xlu1 %v1986_v0  ;;  %1445 = vmatmul.mubr.msk.f32.gmra.mrb[10].mxu1 %vm530_vm7, %v1990_v59  ;;  %v422_v41 = vpop.permute.xlu0 %421 }
 0x103   : > { %619 = vperm.xlu1 %1880, %v2212_v55  }
 0x105   : > { %v401_v32 = vpop.permute.xlu1 %400 }
 0x106   : > { %vm435_vm9 = vcmp.eq.s32.totalorder %v2228_v56, %v401_v32 }
 0x107   : > { %1881 = vset.pattern.permute.xlu1 %v1988_v7  ;;  %1414 = vmatprep.mubr.msk.f32.mxu0 %vm435_vm9, %v1990_v59  ;;  %v509_v43 = vpop.permute.xlu0 %508 }
 0x108   : > { %523 = vperm.xlu1 %1881, %v2212_v55   ;;  %1415 = vmatmul.mubr.msk.f32.gmra.mrb[12].mxu0 %vm339_vm8, %v1990_v59 }
 0x109   : > { %1416 = vmatprep.mubr.msk.f32.mxu0 %vm436_vm10, %v1990_v59  ;;  %vm535_vm10 = vcmp.eq.s32.totalorder %v2228_v56, %v509_v43 }
 0x10a   : > { %v593_v0 = vpop.permute.xlu1 %592 }
 0x10b   : > { %vm627_vm11 = vcmp.eq.s32.totalorder %v2228_v56, %v593_v0  ;;  %v518_v51 = vpop.permute.xlu0 %517 }
 0x10c   : > { %1446 = vmatprep.mubr.msk.f32.mxu1 %vm627_vm11, %v1990_v59 }
 0x10f   : > { %v497_v1 = vpop.permute.xlu1 %496 }
 0x110   : > { %vm531_vm12 = vcmp.eq.s32.totalorder %v2228_v56, %v497_v1  ;;  %v617_v2 = vpop.permute.xlu0 %616 }
 0x111   : > { %1447 = vmatmul.mubr.msk.f32.gmra.mrb[12].mxu1 %vm531_vm12, %v1990_v59  ;;  %vm632_vm12 = vcmp.eq.s32.totalorder %v2228_v56, %v2264_v15 }
 0x114   : > { %v308_v33 = vpop.permute.xlu1 %307 }
 0x115   : > { %vm340_vm13 = vcmp.eq.s32.totalorder %v2228_v56, %v308_v33  ;;  %v332_v55 = vpop.permute.xlu0 %331  ;;  %v2430_v33 = vld [vmem:[%s2562_s3] sm:$0xff] }
 0x116   : > { %1417 = vmatmul.mubr.msk.f32.gmra.mrb[14].mxu0 %vm340_vm13, %v1990_v59 }
 0x119   : > { %v596_v7 = vpop.permute.xlu1 %595 }
 0x11a   : > { %vm628_vm0 = vcmp.eq.s32.totalorder %v2228_v56, %v596_v7  ;;  %v2435_v7 = vld [vmem:[%s2562_s3 + $0x8] sm:$0xff] }
 0x11b   : > { %1448 = vmatprep.mubr.msk.f32.mxu1 %vm628_vm0, %v1990_v59  ;;  %vm442_vm0 = vcmp.eq.s32.totalorder %v2228_v56, %v422_v41 }
 0x11c   : > { %1449 = vmatmul.mubr.msk.f32.gmra.mrb[14].mxu1 %vm532_vm14, %v1990_v59 }
 0x11d   : > { %1450 = vmatprep.mubr.msk.f32.mxu1 %vm629_vm15, %v1990_v59 }
 0x11e   : > { %v407_v34 = vpop.permute.xlu1 %406 }
 0x11f   : > { %vm437_vm1 = vcmp.eq.s32.totalorder %v2228_v56, %v407_v34 }
 0x120   : > { %1418 = vmatprep.mubr.msk.f32.mxu0 %vm437_vm1, %v1990_v59 }
 0x123   : > { %v311_v35 = vpop.permute.xlu1 %310 }
 0x124   : > { %vm341_vm2 = vcmp.eq.s32.totalorder %v2228_v56, %v311_v35 }
 0x125   : > { %1419 = vmatmul.mubr.msk.f32.gmra.mrb[16].mxu0 %vm341_vm2, %v1990_v59  ;;  %vm345_vm2 = vcmp.eq.s32.totalorder %v2228_v56, %v2313_v28 }
 0x128   : > { %v503_v37 = vpop.permute.xlu1 %502 }
 0x129   : > { %vm533_vm3 = vcmp.eq.s32.totalorder %v2228_v56, %v503_v37 }
 0x12a   : > { %1451 = vmatmul.mubr.msk.f32.gmra.mrb[16].mxu1 %vm533_vm3, %v1990_v59 }
 0x12d   : > { %v410_v39 = vpop.permute.xlu1 %409 }
 0x12e   : > { %vm438_vm5 = vcmp.eq.s32.totalorder %v2228_v56, %v410_v39 }
 0x12f   : > { %1420 = vmatprep.mubr.msk.f32.mxu0 %vm438_vm5, %v1990_v59 }
 0x130   : > { %1421 = vmatmul.mubr.msk.f32.gmra.mrb[18].mxu0 %vm342_vm4, %v1990_v59 }
 0x131   : > { %1422 = vmatprep.mubr.msk.f32.mxu0 %vm439_vm6, %v1990_v59  ;;  %vm538_vm6 = vcmp.eq.s32.totalorder %v2228_v56, %v518_v51 }
 0x132   : > { %v602_v36 = vpop.permute.xlu1 %601 }
 0x133   : > { %vm630_vm7 = vcmp.eq.s32.totalorder %v2228_v56, %v602_v36 }
 0x134   : > { %1452 = vmatprep.mubr.msk.f32.mxu1 %vm630_vm7, %v1990_v59 }
 0x137   : > { %v506_v40 = vpop.permute.xlu1 %505 }
 0x138   : > { %vm534_vm8 = vcmp.eq.s32.totalorder %v2228_v56, %v506_v40 }
 0x139   : > { %1453 = vmatmul.mubr.msk.f32.gmra.mrb[18].mxu1 %vm534_vm8, %v1990_v59  ;;  %vm635_vm8 = vcmp.eq.s32.totalorder %v2228_v56, %v617_v2 }
 0x13c   : > { %v317_v42 = vpop.permute.xlu1 %316 }
 0x13d   : > { %vm343_vm9 = vcmp.eq.s32.totalorder %v2228_v56, %v317_v42 }
 0x13e   : > { %1423 = vmatmul.mubr.msk.f32.gmra.mrb[20].mxu0 %vm343_vm9, %v1990_v59 }
 0x141   : > { %v605_v44 = vpop.permute.xlu1 %604 }
 0x142   : > { %vm631_vm11 = vcmp.eq.s32.totalorder %v2228_v56, %v605_v44 }
 0x143   : > { %1454 = vmatprep.mubr.msk.f32.mxu1 %vm631_vm11, %v1990_v59 }
 0x144   : > { %1455 = vmatmul.mubr.msk.f32.gmra.mrb[20].mxu1 %vm535_vm10, %v1990_v59 }
 0x145   : > { %1456 = vmatprep.mubr.msk.f32.mxu1 %vm632_vm12, %v1990_v59  ;;  %vm348_vm12 = vcmp.eq.s32.totalorder %v2228_v56, %v332_v55 }
 0x146   : > { %v416_v45 = vpop.permute.xlu1 %415 }
 0x147   : > { %vm440_vm13 = vcmp.eq.s32.totalorder %v2228_v56, %v416_v45 }
 0x148   : > { %1424 = vmatprep.mubr.msk.f32.mxu0 %vm440_vm13, %v1990_v59 }
 0x14b   : > { %v320_v46 = vpop.permute.xlu1 %319 }
 0x14c   : > { %vm344_vm14 = vcmp.eq.s32.totalorder %v2228_v56, %v320_v46 }
 0x14d   : > { %1425 = vmatmul.mubr.msk.f32.gmra.mrb[22].mxu0 %vm344_vm14, %v1990_v59 }
 0x150   : > { %v512_v47 = vpop.permute.xlu1 %511 }
 0x151   : > { %vm536_vm15 = vcmp.eq.s32.totalorder %v2228_v56, %v512_v47 }
 0x152   : > { %1457 = vmatmul.mubr.msk.f32.gmra.mrb[22].mxu1 %vm536_vm15, %v1990_v59 }
 0x155   : > { %v419_v48 = vpop.permute.xlu1 %418 }
 0x156   : > { %vm441_vm1 = vcmp.eq.s32.totalorder %v2228_v56, %v419_v48 }
 0x157   : > { %1426 = vmatprep.mubr.msk.f32.mxu0 %vm441_vm1, %v1990_v59  ;;  %vm1153_vm1 = vcmask 1042434  }
 0x158   : > { %1427 = vmatmul.mubr.msk.f32.gmra.mrb[24].mxu0 %vm345_vm2, %v1990_v59  ;;  %vm1992_vm2 = vmmov 0  }
 0x159   : > { %1428 = vmatprep.mubr.msk.f32.mxu0 %vm442_vm0, %v1990_v59  ;;  %vm1151_vm0 = vcmask 1041409  }
 0x15a   : > { %v611_v49 = vpop.permute.xlu1 %610 }
 0x15b   : > { %vm633_vm3 = vcmp.eq.s32.totalorder %v2228_v56, %v611_v49 }
 0x15c   : > { %1458 = vmatprep.mubr.msk.f32.mxu1 %vm633_vm3, %v1990_v59  ;;  %vm1155_vm3 = vcmask 1043459  }
 0x15f   : > { %v515_v50 = vpop.permute.xlu1 %514 }
 0x160   : > { %vm537_vm4 = vcmp.eq.s32.totalorder %v2228_v56, %v515_v50 }
 0x161   : > { %1459 = vmatmul.mubr.msk.f32.gmra.mrb[24].mxu1 %vm537_vm4, %v1990_v59  ;;  %vm1157_vm4 = vcmask 1044484  }
 0x164   : > { %v326_v52 = vpop.permute.xlu1 %325 }
 0x165   : > { %vm346_vm5 = vcmp.eq.s32.totalorder %v2228_v56, %v326_v52 }
 0x166   : > { %1429 = vmatmul.mubr.msk.f32.gmra.mrb[26].mxu0 %vm346_vm5, %v1990_v59  ;;  %vm1159_vm5 = vcmask 1045509  }
 0x169   : > { %v614_v17 = vpop.permute.xlu1 %613 }
 0x16a   : > { %vm634_vm7 = vcmp.eq.s32.totalorder %v2228_v56, %v614_v17 }
 0x16b   : > { %1460 = vmatprep.mubr.msk.f32.mxu1 %vm634_vm7, %v1990_v59  ;;  %vm1163_vm7 = vcmask 1047559  }
 0x16c   : > { %1461 = vmatmul.mubr.msk.f32.gmra.mrb[26].mxu1 %vm538_vm6, %v1990_v59  ;;  %vm1161_vm6 = vcmask 1046534  }
 0x16d   : > { %1462 = vmatprep.mubr.msk.f32.mxu1 %vm635_vm8, %v1990_v59 }
 0x16e   : > { %v425_v53 = vpop.permute.xlu1 %424 }
 0x16f   : > { %vm443_vm9 = vcmp.eq.s32.totalorder %v2228_v56, %v425_v53 }
 0x170   : > { %1430 = vmatprep.mubr.msk.f32.mxu0 %vm443_vm9, %v1990_v59 }
 0x173   : > { %v329_v3 = vpop.permute.xlu1 %328 }
 0x174   : > { %vm347_vm10 = vcmp.eq.s32.totalorder %v2228_v56, %v329_v3 }
 0x175   : > { %1431 = vmatmul.mubr.msk.f32.gmra.mrb[28].mxu0 %vm347_vm10, %v1990_v59 }
 0x178   : > { %v521_v54 = vpop.permute.xlu1 %520 }
 0x179   : > { %vm539_vm11 = vcmp.eq.s32.totalorder %v2228_v56, %v521_v54 }
 0x17a   : > { %1463 = vmatmul.mubr.msk.f32.gmra.mrb[28].mxu1 %vm539_vm11, %v1990_v59 }
 0x17d   : > { %v428_v29 = vpop.permute.xlu1 %427 }
 0x17e   : > { %vm444_vm13 = vcmp.eq.s32.totalorder %v2228_v56, %v428_v29 }
 0x17f   : > { %1432 = vmatprep.mubr.msk.f32.mxu0 %vm444_vm13, %v1990_v59 }
 0x180   : > { %1433 = vmatmul.mubr.msk.f32.gmra.mrb[30].mxu0 %vm348_vm12, %v1990_v59 }
 0x182   : > { %v620_v57 = vpop.permute.xlu1 %619 }
 0x183   : > { %vm636_vm14 = vcmp.eq.s32.totalorder %v2228_v56, %v620_v57 }
 0x184   : > { %1464 = vmatprep.mubr.msk.f32.mxu1 %vm636_vm14, %v1990_v59 }
 0x187   : > { %v524_v58 = vpop.permute.xlu1 %523 }
 0x188   : > { %vm540_vm15 = vcmp.eq.s32.totalorder %v2228_v56, %v524_v58 }
 0x189   : > { %1465 = vmatmul.mubr.msk.f32.gmra.mrb[30].mxu1 %vm540_vm15, %v1990_v59 }
 0x194   : > { %v1584_v60 = vpop.f32.mrb[0].mxu1 }
 0x195   : > { %v1585_v61 = vpop.f32.mrb[1].mxu1 }
 0x196   : > { %v1586_v62 = vadd.f32 %v1585_v61, %v1584_v60 }
 0x19f   : > { %v1587_v63 = vpop.f32.mrb[2].mxu1 }
 0x1a0   : > { %v1588_v4 = vpop.f32.mrb[3].mxu1 }
 0x1a1   : > { %v1589_v5 = vadd.f32 %v1588_v4, %v1587_v63 }
 0x1ad   : > { %v1590_v6 = vpop.f32.mrb[4].mxu1 }
 0x1ae   : > { %v1591_v8 = vpop.f32.mrb[5].mxu1 }
 0x1af   : > { %v1592_v9 = vadd.f32 %v1591_v8, %v1590_v6  ;;  %v1125_v6 = vld [vmem:[%s2563_s4 + $0x28] sm:$0xff]  ;;  %v1126_v8 = vld [vmem:[%s2563_s4 + $0x30] sm:$0xff] }
 0x1b6   : > { %v1504_v10 = vpop.f32.mrb[0].mxu0 }
 0x1b7   : > { %v1505_v13 = vpop.f32.mrb[1].mxu0 }
 0x1b8   : > { %v1506_v14 = vadd.f32 %v1505_v13, %v1504_v10  ;;  %v1127_v13 = vld [vmem:[%s2563_s4 + $0x38] sm:$0xff] }
 0x1ba   : > { %v807_v56 = vadd.f32 %v1506_v14, %v2409_v12  ;;  %v1507_v59 = vpop.f32.mrb[2].mxu0 }
 0x1bb   : > { %v1508_v15 = vpop.f32.mrb[3].mxu0 }
 0x1bc   : > { %v952_v16 = vadd.f32 %v1586_v62, %v807_v56  ;;  %v1509_v18 = vadd.f32 %v1508_v15, %v1507_v59  ;;  %v1593_v19 = vpop.f32.mrb[6].mxu1 }
 0x1bd   : > { %v1594_v23 = vpop.f32.mrb[7].mxu1 }
 0x1be   : > { %v812_v27 = vadd.f32 %v1509_v18, %v2409_v12  ;;  %v1595_v11 = vadd.f32 %v1594_v23, %v1593_v19  ;;  %v1510_v28 = vpop.f32.mrb[4].mxu0  ;;  %v1030_v32 = vmax.f32 %v952_v16, 0.0  ;;  %v1758_v16 = vpack.c.bf16 %v1127_v13, %v1126_v8 }
 0x1bf   : > { %v1511_v30 = vpop.f32.mrb[5].mxu0 }
 0x1c0   : > { %v957_v0 = vadd.f32 %v1589_v5, %v812_v27  ;;  %v1512_v1 = vadd.f32 %v1511_v30, %v1510_v28  ;;  %v1048_v39 = vmul.f32 %v2430_v33, %v1030_v32  ;;  %v1124_v5 = vld [vmem:[%s2563_s4 + $0x20] sm:$0xff] }
 0x1c1   : > { %v1755_v10 = vpack.c.bf16 %v1125_v6, %v1124_v5 }
 0x1c2   : > { %v1031_v34 = vmax.f32 %v957_v0, 0.0  ;;  %v817_v35 = vadd.f32 %v1512_v1, %v2409_v12  ;;  %v1513_v37 = vpop.f32.mrb[6].mxu0 }
 0x1c3   : > { %v1514_v38 = vpop.f32.mrb[7].mxu0  ;;  %1756 = vmatpush3.bf16.msra.mxu0 %v1755_v10 }
 0x1c4   : > { %v1049_v36 = vmul.f32 %v2435_v7, %v1031_v34  ;;  %v962_v40 = vadd.f32 %v1592_v9, %v817_v35  ;;  %v1515_v41 = vadd.f32 %v1514_v38, %v1513_v37  ;;  %1757 = vmatprep.subr.bf16.mxu0 %v1991_v20 }
 0x1c6   : > { %v1064_v42 = vmax.f32 %v1048_v39, %v1049_v36  ;;  %v822_v43 = vadd.f32 %v1515_v41, %v2409_v12  ;;  %v1516_v44 = vpop.f32.mrb[8].mxu0  ;;  %v1032_v47 = vmax.f32 %v962_v40, 0.0 }
 0x1c7   : > { %v1517_v45 = vpop.f32.mrb[9].mxu0  ;;  %1759 = vmatpush3.bf16.msra.mxu0 %v1758_v16 }
 0x1c8   : > { %v1065_v46 = vrot.slane %v1064_v42, 4  ;;  %v967_v48 = vadd.f32 %v1595_v11, %v822_v43  ;;  %v1518_v49 = vadd.f32 %v1517_v45, %v1516_v44  ;;  %v1596_v50 = vpop.f32.mrb[8].mxu1  ;;  %v1050_v3 = vmul.f32 %v2430_v33, %v1032_v47  ;;  %1760 = vmatprep.subr.bf16.mxu0 %v1991_v20  ;;  %v1130_v45 = vld [vmem:[%s2563_s4 + $0x50] sm:$0xff] }
 0x1c9   : > { %v1597_v51 = vpop.f32.mrb[9].mxu1  ;;  %v1761_v11 = vpack.c.bf16 %v1129_v22, %v1128_v21 }
 0x1ca   : > { %v1066_v52 = vmax.f32 %v1064_v42, %v1065_v46  ;;  %v1033_v2 = vmax.f32 %v967_v48, 0.0  ;;  %v827_v17 = vadd.f32 %v1518_v49, %v2409_v12  ;;  %v1598_v53 = vadd.f32 %v1597_v51, %v1596_v50  ;;  %v1131_v46 = vld [vmem:[%s2563_s4 + $0x58] sm:$0xff] }
 0x1cb   : > { %1762 = vmatpush3.bf16.msra.mxu0 %v1761_v11  ;;  %v1764_v49 = vpack.c.bf16 %v1131_v46, %v1130_v45 }
 0x1cc   : > { %v1051_v54 = vmul.f32 %v2435_v7, %v1033_v2  ;;  %v972_v55 = vadd.f32 %v1598_v53, %v827_v17  ;;  %v1067_v29 = vrot.slane %v1066_v52, 2  ;;  %1763 = vmatprep.subr.bf16.mxu0 %v1991_v20  ;;  %v1132_v2 = vld [vmem:[%s2563_s4 + $0x60] sm:$0xff]  ;;  %v1133_v17 = vld [vmem:[%s2563_s4 + $0x68] sm:$0xff] }
 0x1cd   : > { %v1767_v53 = vpack.c.bf16 %v1133_v17, %v1132_v2 }
 0x1ce   : > { %v1071_v57 = vmax.f32 %v1050_v3, %v1051_v54  ;;  %v1068_v62 = vmax.f32 %v1066_v52, %v1067_v29  ;;  %v1034_v24 = vmax.f32 %v972_v55, 0.0  ;;  %v1134_v54 = vld [vmem:[%s2563_s4 + $0x70] sm:$0xff]  ;;  %v1135_v55 = vld [vmem:[%s2563_s4 + $0x78] sm:$0xff] }
 0x1cf   : > { %1765 = vmatpush3.bf16.msra.mxu0 %v1764_v49 }
 0x1d0   : > { %v1072_v58 = vrot.slane %v1071_v57, 4  ;;  %v1519_v60 = vpop.f32.mrb[10].mxu0  ;;  %v1069_v56 = vrot.slane %v1068_v62, 1  ;;  %v1052_v0 = vmul.f32 %v2430_v33, %v1034_v24  ;;  %1766 = vmatprep.subr.bf16.mxu0 %v1991_v20 }
 0x1d1   : > { %v1520_v61 = vpop.f32.mrb[11].mxu0 }
 0x1d2   : > { %v1073_v63 = vmax.f32 %v1071_v57, %v1072_v58  ;;  %v1521_v4 = vadd.f32 %v1520_v61, %v1519_v60  ;;  %v1070_v26 = vmax.f32 %v1068_v62, %v1069_v56  ;;  %v1770_v57 = vpack.c.bf16 %v1135_v55, %v1134_v54 }
 0x1d3   : > { %1768 = vmatpush3.bf16.msra.mxu0 %v1767_v53  ;;  %v1993_v58 = vmov 0.0  }
 0x1d4   : > { %v1074_v9 = vrot.slane %v1073_v63, 2  ;;  %v832_v18 = vadd.f32 %v1521_v4, %v2409_v12  ;;  %1681 = vmatprep.mubr.msk.f32.mxu0 %vm1992_vm2, %v1993_v58  ;;  %1769 = vmatprep.subr.bf16.mxu0 %v1991_v20 }
 0x1d5   : > { %v1599_v14 = vpop.f32.mrb[10].mxu1 }
 0x1d6   : > { %v1075_v59 = vmax.f32 %v1073_v63, %v1074_v9  ;;  %v1600_v15 = vpop.f32.mrb[11].mxu1 }
 0x1d7   : > { %v1601_v19 = vadd.f32 %v1600_v15, %v1599_v14  ;;  %1771 = vmatpush3.bf16.msra.mxu0 %v1770_v57 }
 0x1d8   : > { %v1076_v23 = vrot.slane %v1075_v59, 1 }
 0x1d9   : > { %v977_v25 = vadd.f32 %v1601_v19, %v832_v18 }
 0x1da   : > { %v1077_v27 = vmax.f32 %v1075_v59, %v1076_v23 }
 0x1db   : > { %v1035_v28 = vmax.f32 %v977_v25, 0.0  ;;  %v1522_v30 = vpop.f32.mrb[12].mxu0 }
 0x1dc   : > { %v1523_v31 = vpop.f32.mrb[13].mxu0  ;;  %v1152_v32 = vsel %vm1151_vm0, %v1077_v27, %v1070_v26 }
 0x1dd   : > { %v1053_v1 = vmul.f32 %v2435_v7, %v1035_v28  ;;  %v1524_v34 = vadd.f32 %v1523_v31, %v1522_v30 }
 0x1df   : > { %v1078_v35 = vmax.f32 %v1052_v0, %v1053_v1  ;;  %v837_v39 = vadd.f32 %v1524_v34, %v2409_v12 }
 0x1e1   : > { %v1079_v37 = vrot.slane %v1078_v35, 4 }
 0x1e3   : > { %v1080_v38 = vmax.f32 %v1078_v35, %v1079_v37 }
 0x1e4   : > { %v1602_v36 = vpop.f32.mrb[12].mxu1 }
 0x1e5   : > { %v1081_v40 = vrot.slane %v1080_v38, 2  ;;  %v1603_v41 = vpop.f32.mrb[13].mxu1 }
 0x1e6   : > { %v1604_v42 = vadd.f32 %v1603_v41, %v1602_v36 }
 0x1e7   : > { %v1082_v43 = vmax.f32 %v1080_v38, %v1081_v40 }
 0x1e8   : > { %v982_v44 = vadd.f32 %v1604_v42, %v837_v39 }
 0x1e9   : > { %v1083_v47 = vrot.slane %v1082_v43, 1  ;;  %v1525_v48 = vpop.f32.mrb[14].mxu0 }
 0x1ea   : > { %v1526_v50 = vpop.f32.mrb[15].mxu0  ;;  %v1036_v63 = vmax.f32 %v982_v44, 0.0 }
 0x1eb   : > { %v1084_v51 = vmax.f32 %v1082_v43, %v1083_v47  ;;  %v1527_v52 = vadd.f32 %v1526_v50, %v1525_v48 }
 0x1ec   : > { %v1054_v6 = vmul.f32 %v2430_v33, %v1036_v63 }
 0x1ed   : > { %v1154_v3 = vsel %vm1153_vm1, %v1084_v51, %v1152_v32  ;;  %v842_v61 = vadd.f32 %v1527_v52, %v2409_v12 }
 0x1ef   : > { %v1605_v29 = vpop.f32.mrb[14].mxu1 }
 0x1f0   : > { %v1606_v60 = vpop.f32.mrb[15].mxu1 }
 0x1f1   : > { %v1607_v62 = vadd.f32 %v1606_v60, %v1605_v29 }
 0x1f3   : > { %v987_v4 = vadd.f32 %v1607_v62, %v842_v61 }
 0x1f5   : > { %v1037_v5 = vmax.f32 %v987_v4, 0.0 }
 0x1f7   : > { %v1055_v8 = vmul.f32 %v2435_v7, %v1037_v5 }
 0x1f8   : > { %v1528_v9 = vpop.f32.mrb[16].mxu0 }
 0x1f9   : > { %v1085_v10 = vmax.f32 %v1054_v6, %v1055_v8  ;;  %v1529_v13 = vpop.f32.mrb[17].mxu0 }
 0x1fa   : > { %v1530_v14 = vadd.f32 %v1529_v13, %v1528_v9 }
 0x1fb   : > { %v1086_v56 = vrot.slane %v1085_v10, 4 }
 0x1fc   : > { %v847_v18 = vadd.f32 %v1530_v14, %v2409_v12 }
 0x1fd   : > { %v1087_v59 = vmax.f32 %v1085_v10, %v1086_v56  ;;  %v1608_v15 = vpop.f32.mrb[16].mxu1 }
 0x1fe   : > { %v1609_v16 = vpop.f32.mrb[17].mxu1 }
 0x1ff   : > { %v1088_v20 = vrot.slane %v1087_v59, 2  ;;  %v1610_v19 = vadd.f32 %v1609_v16, %v1608_v15 }
 0x201   : > { %v1089_v21 = vmax.f32 %v1087_v59, %v1088_v20  ;;  %v992_v22 = vadd.f32 %v1610_v19, %v847_v18 }
 0x203   : > { %v1090_v23 = vrot.slane %v1089_v21, 1  ;;  %v1531_v24 = vpop.f32.mrb[18].mxu0  ;;  %v1038_v0 = vmax.f32 %v992_v22, 0.0 }
 0x204   : > { %v1532_v25 = vpop.f32.mrb[19].mxu0 }
 0x205   : > { %v1091_v26 = vmax.f32 %v1089_v21, %v1090_v23  ;;  %v1533_v27 = vadd.f32 %v1532_v25, %v1531_v24  ;;  %v1056_v39 = vmul.f32 %v2430_v33, %v1038_v0 }
 0x207   : > { %v1156_v11 = vsel %vm1155_vm3, %v1091_v26, %v1154_v3  ;;  %v852_v28 = vadd.f32 %v1533_v27, %v2409_v12 }
 0x20c   : > { %v1611_v30 = vpop.f32.mrb[18].mxu1 }
 0x20d   : > { %v1612_v31 = vpop.f32.mrb[19].mxu1 }
 0x20e   : > { %v1613_v32 = vadd.f32 %v1612_v31, %v1611_v30 }
 0x210   : > { %v997_v1 = vadd.f32 %v1613_v32, %v852_v28 }
 0x211   : > { %v1534_v34 = vpop.f32.mrb[20].mxu0 }
 0x212   : > { %v1039_v35 = vmax.f32 %v997_v1, 0.0  ;;  %v1535_v37 = vpop.f32.mrb[21].mxu0 }
 0x213   : > { %v1536_v38 = vadd.f32 %v1535_v37, %v1534_v34 }
 0x214   : > { %v1057_v36 = vmul.f32 %v2435_v7, %v1039_v35 }
 0x215   : > { %v857_v44 = vadd.f32 %v1536_v38, %v2409_v12 }
 0x216   : > { %v1092_v40 = vmax.f32 %v1056_v39, %v1057_v36 }
 0x217   : > { %v1614_v41 = vpop.f32.mrb[20].mxu1 }
 0x218   : > { %v1093_v42 = vrot.slane %v1092_v40, 4  ;;  %v1615_v43 = vpop.f32.mrb[21].mxu1 }
 0x219   : > { %v1616_v45 = vadd.f32 %v1615_v43, %v1614_v41 }
 0x21a   : > { %v1094_v46 = vmax.f32 %v1092_v40, %v1093_v42 }
 0x21b   : > { %v1002_v47 = vadd.f32 %v1616_v45, %v857_v44 }
 0x21c   : > { %v1095_v48 = vrot.slane %v1094_v46, 2 }
 0x21d   : > { %v1040_v57 = vmax.f32 %v1002_v47, 0.0 }
 0x21e   : > { %v1096_v49 = vmax.f32 %v1094_v46, %v1095_v48 }
 0x21f   : > { %v1058_v63 = vmul.f32 %v2430_v33, %v1040_v57 }
 0x220   : > { %v1097_v50 = vrot.slane %v1096_v49, 1  ;;  %v1537_v51 = vpop.f32.mrb[22].mxu0 }
 0x221   : > { %v1538_v52 = vpop.f32.mrb[23].mxu0 }
 0x222   : > { %v1098_v2 = vmax.f32 %v1096_v49, %v1097_v50  ;;  %v1539_v17 = vadd.f32 %v1538_v52, %v1537_v51 }
 0x224   : > { %v1158_v53 = vsel %vm1157_vm4, %v1098_v2, %v1156_v11  ;;  %v862_v55 = vadd.f32 %v1539_v17, %v2409_v12 }
 0x225   : > { %v1617_v3 = vpop.f32.mrb[22].mxu1 }
 0x226   : > { %v1618_v54 = vpop.f32.mrb[23].mxu1 }
 0x227   : > { %v1619_v29 = vadd.f32 %v1618_v54, %v1617_v3 }
 0x229   : > { %v1007_v58 = vadd.f32 %v1619_v29, %v862_v55 }
 0x22b   : > { %v1041_v60 = vmax.f32 %v1007_v58, 0.0  ;;  %v1540_v61 = vpop.f32.mrb[24].mxu0 }
 0x22c   : > { %v1541_v62 = vpop.f32.mrb[25].mxu0 }
 0x22d   : > { %v1059_v4 = vmul.f32 %v2435_v7, %v1041_v60  ;;  %v1542_v5 = vadd.f32 %v1541_v62, %v1540_v61 }
 0x22f   : > { %v1099_v6 = vmax.f32 %v1058_v63, %v1059_v4  ;;  %v867_v56 = vadd.f32 %v1542_v5, %v2409_v12  ;;  %v1466_v5 = vld [vmem:[%s2564_s5] ss:$0 sm:$0xff] }
 0x231   : > { %v1100_v8 = vrot.slane %v1099_v6, 4 }
 0x233   : > { %v1101_v9 = vmax.f32 %v1099_v6, %v1100_v8 }
 0x234   : > { %v1620_v10 = vpop.f32.mrb[24].mxu1 }
 0x235   : > { %v1102_v13 = vrot.slane %v1101_v9, 2  ;;  %v1621_v14 = vpop.f32.mrb[25].mxu1 }
 0x236   : > { %v1622_v59 = vadd.f32 %v1621_v14, %v1620_v10 }
 0x237   : > { %v1103_v15 = vmax.f32 %v1101_v9, %v1102_v13 }
 0x238   : > { %v1012_v16 = vadd.f32 %v1622_v59, %v867_v56 }
 0x239   : > { %v1104_v20 = vrot.slane %v1103_v15, 1  ;;  %v1543_v18 = vpop.f32.mrb[26].mxu0 }
 0x23a   : > { %v1544_v19 = vpop.f32.mrb[27].mxu0  ;;  %v1042_v11 = vmax.f32 %v1012_v16, 0.0 }
 0x23b   : > { %v1105_v21 = vmax.f32 %v1103_v15, %v1104_v20  ;;  %v1545_v22 = vadd.f32 %v1544_v19, %v1543_v18 }
 0x23c   : > { %v1060_v31 = vmul.f32 %v2430_v33, %v1042_v11 }
 0x23d   : > { %v1160_v23 = vsel %vm1159_vm5, %v1105_v21, %v1158_v53  ;;  %v872_v26 = vadd.f32 %v1545_v22, %v2409_v12 }
 0x23f   : > { %v1623_v24 = vpop.f32.mrb[26].mxu1 }
 0x240   : > { %v1624_v25 = vpop.f32.mrb[27].mxu1 }
 0x241   : > { %v1625_v27 = vadd.f32 %v1624_v25, %v1623_v24 }
 0x243   : > { %v1017_v28 = vadd.f32 %v1625_v27, %v872_v26 }
 0x245   : > { %v1043_v30 = vmax.f32 %v1017_v28, 0.0 }
 0x247   : > { %v1061_v32 = vmul.f32 %v2435_v7, %v1043_v30 }
 0x248   : > { %v1546_v0 = vpop.f32.mrb[28].mxu0 }
 0x249   : > { %v1106_v1 = vmax.f32 %v1060_v31, %v1061_v32  ;;  %v1547_v34 = vpop.f32.mrb[29].mxu0 }
 0x24a   : > { %v1548_v35 = vadd.f32 %v1547_v34, %v1546_v0 }
 0x24b   : > { %v1107_v37 = vrot.slane %v1106_v1, 4 }
 0x24c   : > { %v877_v41 = vadd.f32 %v1548_v35, %v2409_v12 }
 0x24d   : > { %v1108_v38 = vmax.f32 %v1106_v1, %v1107_v37  ;;  %v1626_v39 = vpop.f32.mrb[28].mxu1 }
 0x24e   : > { %v1627_v36 = vpop.f32.mrb[29].mxu1 }
 0x24f   : > { %v1109_v40 = vrot.slane %v1108_v38, 2  ;;  %v1628_v42 = vadd.f32 %v1627_v36, %v1626_v39 }
 0x251   : > { %v1110_v43 = vmax.f32 %v1108_v38, %v1109_v40  ;;  %v1022_v44 = vadd.f32 %v1628_v42, %v877_v41 }
 0x253   : > { %v1111_v45 = vrot.slane %v1110_v43, 1  ;;  %v1549_v46 = vpop.f32.mrb[30].mxu0  ;;  %v1044_v53 = vmax.f32 %v1022_v44, 0.0 }
 0x254   : > { %v1550_v47 = vpop.f32.mrb[31].mxu0 }
 0x255   : > { %v1551_v48 = vadd.f32 %v1550_v47, %v1549_v46  ;;  %v1112_v49 = vmax.f32 %v1110_v43, %v1111_v45  ;;  %v1062_v55 = vmul.f32 %v2430_v33, %v1044_v53 }
 0x257   : > { %v1162_v50 = vsel %vm1161_vm6, %v1112_v49, %v1160_v23  ;;  %v882_v51 = vadd.f32 %v1551_v48, %v2409_v12 }
 0x25c   : > { %v1629_v52 = vpop.f32.mrb[30].mxu1 }
 0x25d   : > { %v1630_v2 = vpop.f32.mrb[31].mxu1 }
 0x25e   : > { %v1631_v17 = vadd.f32 %v1630_v2, %v1629_v52 }
 0x260   : > { %v1027_v3 = vadd.f32 %v1631_v17, %v882_v51 }
 0x262   : > { %v1045_v54 = vmax.f32 %v1027_v3, 0.0 }
 0x264   : > { %v1063_v29 = vmul.f32 %v2435_v7, %v1045_v54 }
 0x266   : > { %v1113_v57 = vmax.f32 %v1062_v55, %v1063_v29 }
 0x268   : > { %v1114_v58 = vrot.slane %v1113_v57, 4 }
 0x26a   : > { %v1115_v60 = vmax.f32 %v1113_v57, %v1114_v58 }
 0x26c   : > { %v1116_v61 = vrot.slane %v1115_v60, 2 }
 0x26e   : > { %v1117_v62 = vmax.f32 %v1115_v60, %v1116_v61 }
 0x270   : > { %v1118_v63 = vrot.slane %v1117_v62, 1 }
 0x272   : > { %v1119_v12 = vmax.f32 %v1117_v62, %v1118_v63 }
 0x274   : > { %v1164_v4 = vsel %vm1163_vm7, %v1119_v12, %v1162_v50 }
 0x275   : > { %1682 = vmatmul.mubr.f32.vlgmr.msra.gmra.mrb[32].mxu0 %v1164_v4 }
 0x348   : > { %v1232_v6 = vpop.f32.mrb[32].mxu0 }
 0x349   : > { %v1233_v33 = vadd.f32 %v1466_v5, %v1232_v6  ;;  %v1683_v8 = vpop.f32.mrb[33].mxu0 }
 0x34b   : > { %v1467_v7 = vmul.f32 -1.442695, %v1233_v33 }
 0x34d   : > { %1883 = vpow2.f32 %v1467_v7 }
 0x357   : > { %v1884_v9 = vpop.eup %1883 }
 0x358   : > { %v1239_v10 = vadd.f32 1.0, %v1884_v9 }
 0x35a   : > { %1885 = vrcp.f32 %v1239_v10 }
 0x364   : > { %v1886_v13 = vpop.eup %1885 }
 0x365   : > { %1242 = vst [vmem:[%s260_s9] sm:$0xff] %v1886_v13 }
 0x366   : > { %1928 = shalt.err (!%p1925_p7)
}
 0x367   : > { %s1929_s28 = scalar_lea.hbm %s2517_s17, 128  ;;  %s1933_s13 = scalar_lea.hbm %s2565_s6, 256 }
 0x368   : > { %p1930_p8 = scmp.ne.s32.totalorder %s2517_s17, %s1929_s28  ;;  %p1934_p1 = scmp.lt.u32.totalorder %s2517_s17, %s2565_s6 }
 0x369   : > { %p1935_p0 = scmp.lt.u32.totalorder %s1933_s13, %s1929_s28  ;;  %p1937_p6 = scmp.lt.u32.totalorder %s1929_s28, %s2517_s17 }
 0x36a   : > { %p1931_p11 = pnand %p1930_p8, %p2576_p9 }
 0x36b   : > { %p1936_p5 = por %p1935_p0, %p1934_p1 }
 0x36c   : > { %p1932_p13 = pneg %p1931_p11 }
 0x36d   : > { %p1938_p10 = por %p1937_p6, %p1936_p5 }
 0x36f   : > { %p1939_p12 = pnand %p1938_p10, %p1932_p13 }
 0x371   : > { %1942 = shalt.err (!%p1939_p12)
}
 0x372   : > { %1776 = dma.vmem_to_hbm [thread:$0]  (%p2576_p9), %s2519_s14, 128, %s2517_s17, %s1244_s18  }
 0x373 PF: > { %p1788_p2 = scmp.ge.s32.totalorder %s1981_s24, 2  ;;  %s1269_s9 = sand.u32 1, %s1969_s21  }
 0x374   : > { %p2577_p3 = scmp.ne.s32.totalorder %s2570_s8, 0  ;;  %s1270_s15 = scalar_lea.sflag [#allocation4], %s1269_s9 }
 0x376   : > { %p1783_p4 = pnand %p1788_p2, %p2577_p3 }
 0x378   : > { %1964 = dma.done.wait (!%p1783_p4), %s1270_s15, 128  }
 0x379   : > { %1966 = vsyncadd (!%p1783_p4), %s1270_s15, 4294967168  ;;  %p17_p7 = scmp.ge.s32.totalorder %s2055_s27, 4   ;;  %s2578_s21 = smov %s1973_s22 }
 0x37a   : > { %s2579_s22 = smov %s1977_s23  ;;  %s2580_s23 = smov %s2066_s30 }
 0x37b   : > { %s2581_s24 = smov %s2055_s27  ;;  %19 = sbr.rel (!%p17_p7) target bundleno = 4 (0x4), region = 84 }
 0x382   :  { %1275 = vsyncpa [#allocation3], 1 }
 0x383   :  { %1277 = vsyncpa [#allocation3 + $0x1], 1 }
 0x384   :  { %1278 = vsyncpa [#allocation4], 1 }
 0x385   :  { %1280 = vsyncpa [#allocation4 + $0x1], 1 }

</bundles_post_ra>
